<compile_context>
chip_gen: v6e
topology: v6e:2x2x1
jax: 0.10.0
libtpu: 0.0.40
codegen_flags: <defaults>
</compile_context>

<pallas_src>
import functools

import jax
import jax.numpy as jnp
from jax import lax
from jax.experimental import pallas as pl
from jax.experimental.pallas import tpu as pltpu

EPS = 1e-5                       # GroupNorm eps (PyTorch default)
LANE = 128                       # lane width; channel axes padded to this
VMEM_LIMIT = 48 * 1024 * 1024    # > scoped defaults (16/32 MiB), < v7x 64 MiB


def _ceil_to(x, m):
    return (x + m - 1) // m * m


def _conv_len(l, k, pad):
    return l + 2 * pad - k + 1


# ----------------------------- in-kernel helpers ---------------------------- #

def _im2col(x, K, pad, L_out):
    """(L, C) bf16 -> (L_out, K*C) bf16; zero halo built in VMEM, stays bf16."""
    L, C = x.shape
    if pad > 0:
        z = jnp.zeros((pad, C), x.dtype)
        x = jnp.concatenate([z, x, z], axis=0)               # (L + 2*pad, C)
    parts = [x[dk:dk + L_out, :] for dk in range(K)]
    return parts[0] if K == 1 else jnp.concatenate(parts, axis=1)


def _maxpool2(y):
    """MaxPool1d(kernel=2, stride=2) along length: (L, C) -> (L//2, C)."""
    L, C = y.shape
    l_half = L // 2
    if L % 2:                                                 # torch floors odd L
        y = y[:2 * l_half]
    return jnp.max(y.reshape(l_half, 2, C), axis=1)


def _upsample2(h):
    """Nearest-neighbour x2 upsample along length: (Lh, C) -> (2*Lh, C)."""
    Lh, C = h.shape
    return jnp.broadcast_to(h[:, None, :], (Lh, 2, C)).reshape(2 * Lh, C)


def _gn_relu(acc, g, beta, c_real):
    """GroupNorm(num_groups=1) over the real (L, C) elements + affine + ReLU.

    acc: (L_out, C_pad) f32 with padded channels exactly zero.  Two-pass
    statistics; padded lanes are masked so they contribute nothing and the
    output stays exactly zero there."""
    L_out, c_pad = acc.shape
    n = float(L_out * c_real)
    mask = (lax.broadcasted_iota(jnp.int32, (1, c_pad), 1) < c_real
            ).astype(jnp.float32)
    s1 = jnp.sum(jnp.sum(acc, axis=-1, keepdims=True), axis=0, keepdims=True)
    mean = s1 / n
    cen = (acc - mean) * mask                                 # padded lanes -> 0
    s2 = jnp.sum(jnp.sum(cen * cen, axis=-1, keepdims=True), axis=0, keepdims=True)
    var = s2 / n                                              # biased (torch)
    y = cen * lax.rsqrt(var + EPS)
    return jnp.maximum(y * g + beta, 0.0)


# ------------------------------- fused kernel ------------------------------- #

def _unet_kernel(x_ref, *refs, K, pad, down_c, mid_c, up_c):
    """Whole Unet1D forward for a block of Bt samples, fully VMEM-resident.

    refs = [w0, prm0, w1, prm1, ..., w_mid, prm_mid, ..., w_final, b_final, o_ref]
    where prm is (3, C_pad) f32 = [bias; gamma; beta]."""
    o_ref = refs[-1]
    it = iter(refs[:-1])
    Bt = x_ref.shape[0]

    def next_layer():
        return next(it)[...], next(it)[...]

    def conv_gn_relu(slabs, w, prm, c_real):
        # slabs: per-sample (L_out, Kc) bf16.  Stack along M to fill the MXU,
        # then split back per sample for the per-sample GroupNorm.
        L_out = slabs[0].shape[0]
        slab = slabs[0] if Bt == 1 else jnp.concatenate(slabs, axis=0)
        acc = jnp.dot(slab, w, preferred_element_type=jnp.float32) + prm[0:1]
        g, beta = prm[1:2], prm[2:3]
        return [_gn_relu(acc[b * L_out:(b + 1) * L_out], g, beta, c_real)
                for b in range(Bt)]

    # ---- down path: Conv + GN + ReLU, fused MaxPool1d(2) ----
    hs = [x_ref[b] for b in range(Bt)]                        # (L, Ci_pad) bf16
    skips = []
    for c_real in down_c:
        w, prm = next_layer()
        L_out = _conv_len(hs[0].shape[0], K, pad)
        ys = conv_gn_relu([_im2col(h, K, pad, L_out) for h in hs], w, prm, c_real)
        skips.append([y.astype(jnp.bfloat16) for y in ys])
        hs = [_maxpool2(y).astype(jnp.bfloat16) for y in ys]

    # ---- middle block ----
    w, prm = next_layer()
    L_out = _conv_len(hs[0].shape[0], K, pad)
    ys = conv_gn_relu([_im2col(h, K, pad, L_out) for h in hs], w, prm, mid_c)
    hs = [y.astype(jnp.bfloat16) for y in ys]

    # ---- up path: nearest x2 + channel concat folded into one im2col matmul ----
    for li, c_real in enumerate(up_c):
        w, prm = next_layer()
        skip = skips[-li - 1]
        L_out = _conv_len(skip[0].shape[0], K, pad)
        slabs = []
        for b in range(Bt):
            up = _upsample2(hs[b])                            # (2*Lh, C) bf16
            slabs.append(jnp.concatenate(
                [_im2col(up, K, pad, L_out),
                 _im2col(skip[b], K, pad, L_out)], axis=1))   # contraction concat
        ys = conv_gn_relu(slabs, w, prm, c_real)
        hs = [y.astype(jnp.bfloat16) for y in ys]

    # ---- final plain Conv1d + bias (no norm / relu), f32 output ----
    w_fin = next(it)[...]
    b_fin = next(it)[...]
    L_out = _conv_len(hs[0].shape[0], K, pad)
    slabs = [_im2col(h, K, pad, L_out) for h in hs]
    slab = slabs[0] if Bt == 1 else jnp.concatenate(slabs, axis=0)
    acc = jnp.dot(slab, w_fin, preferred_element_type=jnp.float32) + b_fin
    for b in range(Bt):
        o_ref[b] = acc[b * L_out:(b + 1) * L_out]


# ------------------------------- pallas wrapper ------------------------------ #

def _pick_bt(B, L):
    """Samples per grid step: fill the MXU M dim (~128 rows) but keep >=2 grid
    steps when B allows, so both v7x TensorCores get work."""
    bt = min(B, max(1, 128 // max(L, 1)))
    if B >= 2:
        bt = min(bt, B // 2)
    bt = max(bt, 1)
    while B % bt:
        bt -= 1
    return bt


def unet1d_forward(params, x_ncl, padding):
    """x_ncl: (B, C, L) PyTorch layout. Returns (B, out_channels, L_out) f32."""
    B, C, L = x_ncl.shape
    K = params["down"][0]["k"]
    steps = len(params["down"])
    ci_pad0 = _ceil_to(C, LANE)

    x = jnp.transpose(x_ncl, (0, 2, 1))                       # (B, L, C)
    x = jnp.pad(x, ((0, 0), (0, 0), (0, ci_pad0 - C))).astype(jnp.bfloat16)

    # layer-length bookkeeping (mirrors the kernel exactly)
    l = L
    skip_ls = []
    for _ in range(steps):
        lc = _conv_len(l, K, padding)
        skip_ls.append(lc)
        l = lc // 2
    l = _conv_len(l, K, padding)
    for s in range(steps):
        l = _conv_len(skip_ls[-s - 1], K, padding)
    l_final = _conv_len(l, K, padding)

    fin = params["final"]
    out_cpad = fin["prm"].shape[1]
    Bt = _pick_bt(B, L)

    operands = [x]
    in_specs = [pl.BlockSpec((Bt, L, ci_pad0), lambda i: (i, 0, 0))]

    def add(w, prm):
        operands.extend([w, prm])
        in_specs.append(pl.BlockSpec(w.shape, lambda i: (0, 0)))
        in_specs.append(pl.BlockSpec(prm.shape, lambda i: (0, 0)))

    for p in params["down"]:
        add(p["w"], p["prm"])
    add(params["mid"]["w"], params["mid"]["prm"])
    for p in params["up"]:
        add(p["w"], p["prm"])
    add(fin["w"], fin["prm"])

    kern = functools.partial(
        _unet_kernel, K=K, pad=padding,
        down_c=tuple(p["co"] for p in params["down"]),
        mid_c=params["mid"]["co"],
        up_c=tuple(p["co"] for p in params["up"]))

    y = pl.pallas_call(
        kern,
        out_shape=jax.ShapeDtypeStruct((B, l_final, out_cpad), jnp.float32),
        grid=(B // Bt,),
        in_specs=in_specs,
        out_specs=pl.BlockSpec((Bt, l_final, out_cpad), lambda i: (i, 0, 0)),
        compiler_params=pltpu.CompilerParams(
            dimension_semantics=("parallel",),
            vmem_limit_bytes=VMEM_LIMIT),
    )(*operands)
    return jnp.transpose(y[:, :, :fin["co"]], (0, 2, 1))


# ------------------------------ parameter init ------------------------------ #

def _pack_weight(w_q, ci_pad, co_pad):
    """(K, ci, co) bf16 -> (K*ci_pad, co_pad) bf16 zero-padded to dense lanes.
    Row order (dk*ci_pad + ci) matches the in-kernel im2col column order."""
    K, ci, co = w_q.shape
    wp = jnp.zeros((K, ci_pad, co_pad), jnp.bfloat16)
    wp = wp.at[:, :ci, :co].set(w_q)
    return wp.reshape(K * ci_pad, co_pad)


def _pack_gn_params(b, co, co_pad):
    prm = jnp.zeros((3, co_pad), jnp.float32)
    prm = prm.at[0, :co].set(b)            # conv bias
    prm = prm.at[1, :co].set(1.0)          # GroupNorm gamma (init = 1)
    return prm                             # row 2: beta = 0


def init_conv_params(key, ci, co, k):
    kw, kb = jax.random.split(key)
    bound = 1.0 / (ci * k) ** 0.5
    w = jax.random.uniform(kw, (k, ci, co), jnp.float32, -bound, bound)
    b = jax.random.uniform(kb, (co,), jnp.float32, -bound, bound)
    return {"k": k, "ci": ci, "co": co,
            "w_q": w.astype(jnp.bfloat16), "b_raw": b}


def init_unet_params(key, in_channels, out_channels, start_filters, steps, k):
    keys = jax.random.split(key, 2 * steps + 2)
    it = iter(keys)
    down = []
    for i in range(steps):
        in_c = in_channels if i == 0 else start_filters * 2 ** (i - 1)
        out_c = start_filters * 2 ** i
        p = init_conv_params(next(it), in_c, out_c, k)
        p["w"] = _pack_weight(p["w_q"], _ceil_to(in_c, LANE), _ceil_to(out_c, LANE))
        p["prm"] = _pack_gn_params(p["b_raw"], out_c, _ceil_to(out_c, LANE))
        down.append(p)
    mid_c = start_filters * 2 ** (steps - 1)
    mid = init_conv_params(next(it), mid_c, mid_c, k)
    mid["w"] = _pack_weight(mid["w_q"], _ceil_to(mid_c, LANE), _ceil_to(mid_c, LANE))
    mid["prm"] = _pack_gn_params(mid["b_raw"], mid_c, _ceil_to(mid_c, LANE))
    up = []
    for i in reversed(range(steps)):
        in_c = start_filters * 2 ** (i + 1)
        out_c = out_channels if i == 0 else start_filters * 2 ** (i - 1)
        p = init_conv_params(next(it), in_c, out_c, k)
        c_half = in_c // 2                 # concat order is [upsampled, skip]
        co_pad = _ceil_to(out_c, LANE)
        ch_pad = _ceil_to(c_half, LANE)
        w_up = _pack_weight(p["w_q"][:, :c_half, :], ch_pad, co_pad)
        w_sk = _pack_weight(p["w_q"][:, c_half:, :], ch_pad, co_pad)
        p["w"] = jnp.concatenate([w_up, w_sk], axis=0)   # one contraction-axis matmul
        p["prm"] = _pack_gn_params(p["b_raw"], out_c, co_pad)
        up.append(p)
    fin = init_conv_params(next(it), out_channels, out_channels, k)
    ci_pad = _ceil_to(out_channels, LANE)
    co_pad = _ceil_to(out_channels, LANE)
    fin["w"] = _pack_weight(fin["w_q"], ci_pad, co_pad)
    fin["prm"] = jnp.zeros((1, co_pad), jnp.float32).at[0, :out_channels].set(fin["b_raw"])
    return {"down": down, "mid": mid, "up": up, "final": fin}


# ----------------------------- pure-JAX reference --------------------------- #
# Matches the kernel's precision policy (bf16 matmul operands / bf16 activation
# storage, f32 accumulation and normalization) so the comparison isolates the
# kernel math from expected bf16 rounding.

def _ref_conv1d(x, w_q, b, padding):
    w = jnp.transpose(w_q, (2, 1, 0))                         # (Co, Ci, K) bf16
    y = lax.conv_general_dilated(
        x.astype(jnp.bfloat16), w, window_strides=(1,),
        padding=[(padding, padding)],
        dimension_numbers=("NCH", "OIH", "NCH"),
        preferred_element_type=jnp.float32)
    return y + b[None, :, None]


def _ref_block(x, p, padding):
    y = _ref_conv1d(x, p["w_q"], p["b_raw"], padding)
    mean = jnp.mean(y, axis=(1, 2), keepdims=True)
    var = jnp.mean((y - mean) ** 2, axis=(1, 2), keepdims=True)
    y = (y - mean) * lax.rsqrt(var + EPS)                     # gamma=1, beta=0
    y = jnp.maximum(y, 0.0)
    return y.astype(jnp.bfloat16).astype(jnp.float32)         # bf16 activation storage


def unet1d_ref(params, x, padding):
    h = x
    skips = []
    for p in params["down"]:
        c = _ref_block(h, p, padding)
        skips.append(c)
        B, C, L = c.shape
        h = jnp.max(c.reshape(B, C, L // 2, 2), axis=-1)
    h = _ref_block(h, params["mid"], padding)
    for i, p in enumerate(params["up"]):
        h = jnp.repeat(h, 2, axis=2)
        h = jnp.concatenate([h, skips[-i - 1]], axis=1)
        h = _ref_block(h, p, padding)
    return _ref_conv1d(h, params["final"]["w_q"], params["final"]["b_raw"], padding)


# ------------------------------------ main ----------------------------------- #

if __name__ == "__main__":
    IN_C, OUT_C, SF, STEPS = 4, 4, 8, 2
    KSIZE, STRIDE, PAD = 3, 1, 1
    B, L = 2, 16

    key = jax.random.PRNGKey(0)
    kp, kx = jax.random.split(key)
    params = init_unet_params(kp, IN_C, OUT_C, SF, STEPS, KSIZE)
    x = jax.random.normal(kx, (B, IN_C, L), jnp.float32)

    out = jax.block_until_ready(unet1d_forward(params, x, PAD))
    ref = unet1d_ref(params, x, PAD)

    assert out.shape == (B, OUT_C, L), out.shape
    err = float(jnp.max(jnp.abs(out - ref)))
    assert jnp.allclose(out, ref, atol=2.5e-2, rtol=2.5e-2), err
    print("KERNEL_OK")
</pallas_src>

<mosaic_0001>
module attributes {stable_mosaic.version = 11 : i64} {
  func.func @_unet_kernel(%arg0: i32, %arg1: memref<1x16x128xbf16, #tpu.memory_space<vmem>>, %arg2: memref<384x128xbf16, #tpu.memory_space<vmem>>, %arg3: memref<3x128xf32, #tpu.memory_space<vmem>>, %arg4: memref<384x128xbf16, #tpu.memory_space<vmem>>, %arg5: memref<3x128xf32, #tpu.memory_space<vmem>>, %arg6: memref<384x128xbf16, #tpu.memory_space<vmem>>, %arg7: memref<3x128xf32, #tpu.memory_space<vmem>>, %arg8: memref<768x128xbf16, #tpu.memory_space<vmem>>, %arg9: memref<3x128xf32, #tpu.memory_space<vmem>>, %arg10: memref<768x128xbf16, #tpu.memory_space<vmem>>, %arg11: memref<3x128xf32, #tpu.memory_space<vmem>>, %arg12: memref<384x128xbf16, #tpu.memory_space<vmem>>, %arg13: memref<1x128xf32, #tpu.memory_space<vmem>>, %arg14: memref<1x16x128xf32, #tpu.memory_space<vmem>>) attributes {dimension_semantics = [#tpu.dimension_semantics<parallel>], iteration_bounds = array<i64: 2>, scalar_prefetch = 0 : i64, scratch_operands = 0 : i64, tpu.core_type = #tpu.core_type<tc>, window_params = [{transform_indices = @transform_0, window_bounds = array<i64: 1, 16, 128>}, {pipeline_mode = #tpu.pipeline_mode<synchronous>, transform_indices = @transform_1, window_bounds = array<i64: 384, 128>}, {pipeline_mode = #tpu.pipeline_mode<synchronous>, transform_indices = @transform_2, window_bounds = array<i64: 3, 128>}, {pipeline_mode = #tpu.pipeline_mode<synchronous>, transform_indices = @transform_3, window_bounds = array<i64: 384, 128>}, {pipeline_mode = #tpu.pipeline_mode<synchronous>, transform_indices = @transform_4, window_bounds = array<i64: 3, 128>}, {pipeline_mode = #tpu.pipeline_mode<synchronous>, transform_indices = @transform_5, window_bounds = array<i64: 384, 128>}, {pipeline_mode = #tpu.pipeline_mode<synchronous>, transform_indices = @transform_6, window_bounds = array<i64: 3, 128>}, {pipeline_mode = #tpu.pipeline_mode<synchronous>, transform_indices = @transform_7, window_bounds = array<i64: 768, 128>}, {pipeline_mode = #tpu.pipeline_mode<synchronous>, transform_indices = @transform_8, window_bounds = array<i64: 3, 128>}, {pipeline_mode = #tpu.pipeline_mode<synchronous>, transform_indices = @transform_9, window_bounds = array<i64: 768, 128>}, {pipeline_mode = #tpu.pipeline_mode<synchronous>, transform_indices = @transform_10, window_bounds = array<i64: 3, 128>}, {pipeline_mode = #tpu.pipeline_mode<synchronous>, transform_indices = @transform_11, window_bounds = array<i64: 384, 128>}, {pipeline_mode = #tpu.pipeline_mode<synchronous>, transform_indices = @transform_12, window_bounds = array<i64: 1, 128>}, {transform_indices = @transform_13, window_bounds = array<i64: 1, 16, 128>}]} {
    %c0 = arith.constant 0 : index
    %c0_0 = arith.constant 0 : index
    %c0_1 = arith.constant 0 : index
    %0 = vector.load %arg1[%c0, %c0_0, %c0_1] : memref<1x16x128xbf16, #tpu.memory_space<vmem>>, vector<1x16x128xbf16>
    %1 = vector.shape_cast %0 : vector<1x16x128xbf16> to vector<16x128xbf16>
    %c0_2 = arith.constant 0 : index
    %c0_3 = arith.constant 0 : index
    %2 = vector.load %arg2[%c0_2, %c0_3] : memref<384x128xbf16, #tpu.memory_space<vmem>>, vector<384x128xbf16>
    %c0_4 = arith.constant 0 : index
    %c0_5 = arith.constant 0 : index
    %3 = vector.load %arg3[%c0_4, %c0_5] : memref<3x128xf32, #tpu.memory_space<vmem>>, vector<3x128xf32>
    %cst = arith.constant 0.000000e+00 : bf16
    %4 = vector.broadcast %cst : bf16 to vector<1x128xbf16>
    %5 = tpu.concatenate %4, %1, %4 in 0 : vector<1x128xbf16>, vector<16x128xbf16>, vector<1x128xbf16> -> vector<18x128xbf16>
    %6 = vector.extract_strided_slice %5 {offsets = [0, 0], sizes = [16, 128], strides = [1, 1]} : vector<18x128xbf16> to vector<16x128xbf16>
    %7 = vector.extract_strided_slice %5 {offsets = [1, 0], sizes = [16, 128], strides = [1, 1]} : vector<18x128xbf16> to vector<16x128xbf16>
    %8 = vector.extract_strided_slice %5 {offsets = [2, 0], sizes = [16, 128], strides = [1, 1]} : vector<18x128xbf16> to vector<16x128xbf16>
    %9 = tpu.concatenate %6, %7, %8 in 1 : vector<16x128xbf16>, vector<16x128xbf16>, vector<16x128xbf16> -> vector<16x384xbf16>
    %cst_6 = arith.constant dense<0.000000e+00> : vector<16x128xf32>
    %10 = tpu.matmul %9, %2, %cst_6 {dimension_numbers = #tpu.dot_dimension_numbers<[1], [0], [0], [1], [0, 0, 1, 1], [], []>} : vector<16x384xbf16>, vector<384x128xbf16>, vector<16x128xf32> -> vector<16x128xf32>
    %11 = vector.extract_strided_slice %3 {offsets = [0, 0], sizes = [1, 128], strides = [1, 1]} : vector<3x128xf32> to vector<1x128xf32>
    %12 = vector.broadcast %11 : vector<1x128xf32> to vector<16x128xf32>
    %13 = arith.addf %10, %12 : vector<16x128xf32>
    %14 = vector.extract_strided_slice %3 {offsets = [1, 0], sizes = [1, 128], strides = [1, 1]} : vector<3x128xf32> to vector<1x128xf32>
    %15 = vector.extract_strided_slice %3 {offsets = [2, 0], sizes = [1, 128], strides = [1, 1]} : vector<3x128xf32> to vector<1x128xf32>
    %16 = tpu.iota {dimensions = array<i32: 1>} : vector<1x128xi32>
    %c8_i32 = arith.constant 8 : i32
    %17 = vector.broadcast %c8_i32 : i32 to vector<1x128xi32>
    %18 = arith.cmpi slt, %16, %17 : vector<1x128xi32>
    %19 = arith.extui %18 : vector<1x128xi1> to vector<1x128xi32>
    %20 = arith.sitofp %19 : vector<1x128xi32> to vector<1x128xf32>
    %cst_7 = arith.constant dense<0.000000e+00> : vector<16xf32>
    %21 = vector.multi_reduction <add>, %13, %cst_7 [1] : vector<16x128xf32> to vector<16xf32>
    %22 = vector.shape_cast %21 : vector<16xf32> to vector<16x1xf32>
    %cst_8 = arith.constant dense<0.000000e+00> : vector<1xf32>
    %23 = vector.multi_reduction <add>, %22, %cst_8 [0] : vector<16x1xf32> to vector<1xf32>
    %24 = vector.shape_cast %23 : vector<1xf32> to vector<1x1xf32>
    %cst_9 = arith.constant 1.280000e+02 : f32
    %25 = vector.broadcast %cst_9 : f32 to vector<1x1xf32>
    %26 = arith.divf %24, %25 : vector<1x1xf32>
    %27 = vector.broadcast %26 : vector<1x1xf32> to vector<16x128xf32>
    %28 = arith.subf %13, %27 : vector<16x128xf32>
    %29 = vector.broadcast %20 : vector<1x128xf32> to vector<16x128xf32>
    %30 = arith.mulf %28, %29 : vector<16x128xf32>
    %31 = arith.mulf %30, %30 : vector<16x128xf32>
    %cst_10 = arith.constant dense<0.000000e+00> : vector<16xf32>
    %32 = vector.multi_reduction <add>, %31, %cst_10 [1] : vector<16x128xf32> to vector<16xf32>
    %33 = vector.shape_cast %32 : vector<16xf32> to vector<16x1xf32>
    %cst_11 = arith.constant dense<0.000000e+00> : vector<1xf32>
    %34 = vector.multi_reduction <add>, %33, %cst_11 [0] : vector<16x1xf32> to vector<1xf32>
    %35 = vector.shape_cast %34 : vector<1xf32> to vector<1x1xf32>
    %cst_12 = arith.constant 1.280000e+02 : f32
    %36 = vector.broadcast %cst_12 : f32 to vector<1x1xf32>
    %37 = arith.divf %35, %36 : vector<1x1xf32>
    %cst_13 = arith.constant 9.99999974E-6 : f32
    %38 = vector.broadcast %cst_13 : f32 to vector<1x1xf32>
    %39 = arith.addf %37, %38 : vector<1x1xf32>
    %40 = math.rsqrt %39 : vector<1x1xf32>
    %41 = vector.broadcast %40 : vector<1x1xf32> to vector<16x128xf32>
    %42 = arith.mulf %30, %41 : vector<16x128xf32>
    %43 = vector.broadcast %14 : vector<1x128xf32> to vector<16x128xf32>
    %44 = arith.mulf %42, %43 : vector<16x128xf32>
    %45 = vector.broadcast %15 : vector<1x128xf32> to vector<16x128xf32>
    %46 = arith.addf %44, %45 : vector<16x128xf32>
    %cst_14 = arith.constant 0.000000e+00 : f32
    %47 = vector.broadcast %cst_14 : f32 to vector<16x128xf32>
    %48 = arith.maximumf %46, %47 : vector<16x128xf32>
    %49 = arith.truncf %48 : vector<16x128xf32> to vector<16x128xbf16>
    %50 = vector.shape_cast %48 : vector<16x128xf32> to vector<8x2x128xf32>
    %cst_15 = arith.constant dense<0xFF800000> : vector<8x128xf32>
    %51 = vector.multi_reduction <maximumf>, %50, %cst_15 [1] : vector<8x2x128xf32> to vector<8x128xf32>
    %52 = arith.truncf %51 : vector<8x128xf32> to vector<8x128xbf16>
    %c0_16 = arith.constant 0 : index
    %c0_17 = arith.constant 0 : index
    %53 = vector.load %arg4[%c0_16, %c0_17] : memref<384x128xbf16, #tpu.memory_space<vmem>>, vector<384x128xbf16>
    %c0_18 = arith.constant 0 : index
    %c0_19 = arith.constant 0 : index
    %54 = vector.load %arg5[%c0_18, %c0_19] : memref<3x128xf32, #tpu.memory_space<vmem>>, vector<3x128xf32>
    %cst_20 = arith.constant 0.000000e+00 : bf16
    %55 = vector.broadcast %cst_20 : bf16 to vector<1x128xbf16>
    %56 = tpu.concatenate %55, %52, %55 in 0 : vector<1x128xbf16>, vector<8x128xbf16>, vector<1x128xbf16> -> vector<10x128xbf16>
    %57 = vector.extract_strided_slice %56 {offsets = [0, 0], sizes = [8, 128], strides = [1, 1]} : vector<10x128xbf16> to vector<8x128xbf16>
    %58 = vector.extract_strided_slice %56 {offsets = [1, 0], sizes = [8, 128], strides = [1, 1]} : vector<10x128xbf16> to vector<8x128xbf16>
    %59 = vector.extract_strided_slice %56 {offsets = [2, 0], sizes = [8, 128], strides = [1, 1]} : vector<10x128xbf16> to vector<8x128xbf16>
    %60 = tpu.concatenate %57, %58, %59 in 1 : vector<8x128xbf16>, vector<8x128xbf16>, vector<8x128xbf16> -> vector<8x384xbf16>
    %cst_21 = arith.constant dense<0.000000e+00> : vector<8x128xf32>
    %61 = tpu.matmul %60, %53, %cst_21 {dimension_numbers = #tpu.dot_dimension_numbers<[1], [0], [0], [1], [0, 0, 1, 1], [], []>} : vector<8x384xbf16>, vector<384x128xbf16>, vector<8x128xf32> -> vector<8x128xf32>
    %62 = vector.extract_strided_slice %54 {offsets = [0, 0], sizes = [1, 128], strides = [1, 1]} : vector<3x128xf32> to vector<1x128xf32>
    %63 = vector.broadcast %62 : vector<1x128xf32> to vector<8x128xf32>
    %64 = arith.addf %61, %63 : vector<8x128xf32>
    %65 = vector.extract_strided_slice %54 {offsets = [1, 0], sizes = [1, 128], strides = [1, 1]} : vector<3x128xf32> to vector<1x128xf32>
    %66 = vector.extract_strided_slice %54 {offsets = [2, 0], sizes = [1, 128], strides = [1, 1]} : vector<3x128xf32> to vector<1x128xf32>
    %67 = tpu.iota {dimensions = array<i32: 1>} : vector<1x128xi32>
    %c16_i32 = arith.constant 16 : i32
    %68 = vector.broadcast %c16_i32 : i32 to vector<1x128xi32>
    %69 = arith.cmpi slt, %67, %68 : vector<1x128xi32>
    %70 = arith.extui %69 : vector<1x128xi1> to vector<1x128xi32>
    %71 = arith.sitofp %70 : vector<1x128xi32> to vector<1x128xf32>
    %cst_22 = arith.constant dense<0.000000e+00> : vector<8xf32>
    %72 = vector.multi_reduction <add>, %64, %cst_22 [1] : vector<8x128xf32> to vector<8xf32>
    %73 = vector.shape_cast %72 : vector<8xf32> to vector<8x1xf32>
    %cst_23 = arith.constant dense<0.000000e+00> : vector<1xf32>
    %74 = vector.multi_reduction <add>, %73, %cst_23 [0] : vector<8x1xf32> to vector<1xf32>
    %75 = vector.shape_cast %74 : vector<1xf32> to vector<1x1xf32>
    %cst_24 = arith.constant 1.280000e+02 : f32
    %76 = vector.broadcast %cst_24 : f32 to vector<1x1xf32>
    %77 = arith.divf %75, %76 : vector<1x1xf32>
    %78 = vector.broadcast %77 : vector<1x1xf32> to vector<8x128xf32>
    %79 = arith.subf %64, %78 : vector<8x128xf32>
    %80 = vector.broadcast %71 : vector<1x128xf32> to vector<8x128xf32>
    %81 = arith.mulf %79, %80 : vector<8x128xf32>
    %82 = arith.mulf %81, %81 : vector<8x128xf32>
    %cst_25 = arith.constant dense<0.000000e+00> : vector<8xf32>
    %83 = vector.multi_reduction <add>, %82, %cst_25 [1] : vector<8x128xf32> to vector<8xf32>
    %84 = vector.shape_cast %83 : vector<8xf32> to vector<8x1xf32>
    %cst_26 = arith.constant dense<0.000000e+00> : vector<1xf32>
    %85 = vector.multi_reduction <add>, %84, %cst_26 [0] : vector<8x1xf32> to vector<1xf32>
    %86 = vector.shape_cast %85 : vector<1xf32> to vector<1x1xf32>
    %cst_27 = arith.constant 1.280000e+02 : f32
    %87 = vector.broadcast %cst_27 : f32 to vector<1x1xf32>
    %88 = arith.divf %86, %87 : vector<1x1xf32>
    %cst_28 = arith.constant 9.99999974E-6 : f32
    %89 = vector.broadcast %cst_28 : f32 to vector<1x1xf32>
    %90 = arith.addf %88, %89 : vector<1x1xf32>
    %91 = math.rsqrt %90 : vector<1x1xf32>
    %92 = vector.broadcast %91 : vector<1x1xf32> to vector<8x128xf32>
    %93 = arith.mulf %81, %92 : vector<8x128xf32>
    %94 = vector.broadcast %65 : vector<1x128xf32> to vector<8x128xf32>
    %95 = arith.mulf %93, %94 : vector<8x128xf32>
    %96 = vector.broadcast %66 : vector<1x128xf32> to vector<8x128xf32>
    %97 = arith.addf %95, %96 : vector<8x128xf32>
    %cst_29 = arith.constant 0.000000e+00 : f32
    %98 = vector.broadcast %cst_29 : f32 to vector<8x128xf32>
    %99 = arith.maximumf %97, %98 : vector<8x128xf32>
    %100 = arith.truncf %99 : vector<8x128xf32> to vector<8x128xbf16>
    %101 = vector.shape_cast %99 : vector<8x128xf32> to vector<4x2x128xf32>
    %cst_30 = arith.constant dense<0xFF800000> : vector<4x128xf32>
    %102 = vector.multi_reduction <maximumf>, %101, %cst_30 [1] : vector<4x2x128xf32> to vector<4x128xf32>
    %103 = arith.truncf %102 : vector<4x128xf32> to vector<4x128xbf16>
    %c0_31 = arith.constant 0 : index
    %c0_32 = arith.constant 0 : index
    %104 = vector.load %arg6[%c0_31, %c0_32] : memref<384x128xbf16, #tpu.memory_space<vmem>>, vector<384x128xbf16>
    %c0_33 = arith.constant 0 : index
    %c0_34 = arith.constant 0 : index
    %105 = vector.load %arg7[%c0_33, %c0_34] : memref<3x128xf32, #tpu.memory_space<vmem>>, vector<3x128xf32>
    %cst_35 = arith.constant 0.000000e+00 : bf16
    %106 = vector.broadcast %cst_35 : bf16 to vector<1x128xbf16>
    %107 = tpu.concatenate %106, %103, %106 in 0 : vector<1x128xbf16>, vector<4x128xbf16>, vector<1x128xbf16> -> vector<6x128xbf16>
    %108 = vector.extract_strided_slice %107 {offsets = [0, 0], sizes = [4, 128], strides = [1, 1]} : vector<6x128xbf16> to vector<4x128xbf16>
    %109 = vector.extract_strided_slice %107 {offsets = [1, 0], sizes = [4, 128], strides = [1, 1]} : vector<6x128xbf16> to vector<4x128xbf16>
    %110 = vector.extract_strided_slice %107 {offsets = [2, 0], sizes = [4, 128], strides = [1, 1]} : vector<6x128xbf16> to vector<4x128xbf16>
    %111 = tpu.concatenate %108, %109, %110 in 1 : vector<4x128xbf16>, vector<4x128xbf16>, vector<4x128xbf16> -> vector<4x384xbf16>
    %cst_36 = arith.constant dense<0.000000e+00> : vector<4x128xf32>
    %112 = tpu.matmul %111, %104, %cst_36 {dimension_numbers = #tpu.dot_dimension_numbers<[1], [0], [0], [1], [0, 0, 1, 1], [], []>} : vector<4x384xbf16>, vector<384x128xbf16>, vector<4x128xf32> -> vector<4x128xf32>
    %113 = vector.extract_strided_slice %105 {offsets = [0, 0], sizes = [1, 128], strides = [1, 1]} : vector<3x128xf32> to vector<1x128xf32>
    %114 = vector.broadcast %113 : vector<1x128xf32> to vector<4x128xf32>
    %115 = arith.addf %112, %114 : vector<4x128xf32>
    %116 = vector.extract_strided_slice %105 {offsets = [1, 0], sizes = [1, 128], strides = [1, 1]} : vector<3x128xf32> to vector<1x128xf32>
    %117 = vector.extract_strided_slice %105 {offsets = [2, 0], sizes = [1, 128], strides = [1, 1]} : vector<3x128xf32> to vector<1x128xf32>
    %118 = tpu.iota {dimensions = array<i32: 1>} : vector<1x128xi32>
    %c16_i32_37 = arith.constant 16 : i32
    %119 = vector.broadcast %c16_i32_37 : i32 to vector<1x128xi32>
    %120 = arith.cmpi slt, %118, %119 : vector<1x128xi32>
    %121 = arith.extui %120 : vector<1x128xi1> to vector<1x128xi32>
    %122 = arith.sitofp %121 : vector<1x128xi32> to vector<1x128xf32>
    %cst_38 = arith.constant dense<0.000000e+00> : vector<4xf32>
    %123 = vector.multi_reduction <add>, %115, %cst_38 [1] : vector<4x128xf32> to vector<4xf32>
    %124 = vector.shape_cast %123 : vector<4xf32> to vector<4x1xf32>
    %cst_39 = arith.constant dense<0.000000e+00> : vector<1xf32>
    %125 = vector.multi_reduction <add>, %124, %cst_39 [0] : vector<4x1xf32> to vector<1xf32>
    %126 = vector.shape_cast %125 : vector<1xf32> to vector<1x1xf32>
    %cst_40 = arith.constant 6.400000e+01 : f32
    %127 = vector.broadcast %cst_40 : f32 to vector<1x1xf32>
    %128 = arith.divf %126, %127 : vector<1x1xf32>
    %129 = vector.broadcast %128 : vector<1x1xf32> to vector<4x128xf32>
    %130 = arith.subf %115, %129 : vector<4x128xf32>
    %131 = vector.broadcast %122 : vector<1x128xf32> to vector<4x128xf32>
    %132 = arith.mulf %130, %131 : vector<4x128xf32>
    %133 = arith.mulf %132, %132 : vector<4x128xf32>
    %cst_41 = arith.constant dense<0.000000e+00> : vector<4xf32>
    %134 = vector.multi_reduction <add>, %133, %cst_41 [1] : vector<4x128xf32> to vector<4xf32>
    %135 = vector.shape_cast %134 : vector<4xf32> to vector<4x1xf32>
    %cst_42 = arith.constant dense<0.000000e+00> : vector<1xf32>
    %136 = vector.multi_reduction <add>, %135, %cst_42 [0] : vector<4x1xf32> to vector<1xf32>
    %137 = vector.shape_cast %136 : vector<1xf32> to vector<1x1xf32>
    %cst_43 = arith.constant 6.400000e+01 : f32
    %138 = vector.broadcast %cst_43 : f32 to vector<1x1xf32>
    %139 = arith.divf %137, %138 : vector<1x1xf32>
    %cst_44 = arith.constant 9.99999974E-6 : f32
    %140 = vector.broadcast %cst_44 : f32 to vector<1x1xf32>
    %141 = arith.addf %139, %140 : vector<1x1xf32>
    %142 = math.rsqrt %141 : vector<1x1xf32>
    %143 = vector.broadcast %142 : vector<1x1xf32> to vector<4x128xf32>
    %144 = arith.mulf %132, %143 : vector<4x128xf32>
    %145 = vector.broadcast %116 : vector<1x128xf32> to vector<4x128xf32>
    %146 = arith.mulf %144, %145 : vector<4x128xf32>
    %147 = vector.broadcast %117 : vector<1x128xf32> to vector<4x128xf32>
    %148 = arith.addf %146, %147 : vector<4x128xf32>
    %cst_45 = arith.constant 0.000000e+00 : f32
    %149 = vector.broadcast %cst_45 : f32 to vector<4x128xf32>
    %150 = arith.maximumf %148, %149 : vector<4x128xf32>
    %151 = arith.truncf %150 : vector<4x128xf32> to vector<4x128xbf16>
    %c0_46 = arith.constant 0 : index
    %c0_47 = arith.constant 0 : index
    %152 = vector.load %arg8[%c0_46, %c0_47] : memref<768x128xbf16, #tpu.memory_space<vmem>>, vector<768x128xbf16>
    %c0_48 = arith.constant 0 : index
    %c0_49 = arith.constant 0 : index
    %153 = vector.load %arg9[%c0_48, %c0_49] : memref<3x128xf32, #tpu.memory_space<vmem>>, vector<3x128xf32>
    %154 = vector.shape_cast %151 : vector<4x128xbf16> to vector<4x1x128xbf16>
    %155 = vector.shape_cast %154 : vector<4x1x128xbf16> to vector<4x1x128xbf16>
    %156 = vector.broadcast %155 : vector<4x1x128xbf16> to vector<4x2x128xbf16>
    %157 = vector.shape_cast %156 : vector<4x2x128xbf16> to vector<8x128xbf16>
    %cst_50 = arith.constant 0.000000e+00 : bf16
    %158 = vector.broadcast %cst_50 : bf16 to vector<1x128xbf16>
    %159 = tpu.concatenate %158, %157, %158 in 0 : vector<1x128xbf16>, vector<8x128xbf16>, vector<1x128xbf16> -> vector<10x128xbf16>
    %160 = vector.extract_strided_slice %159 {offsets = [0, 0], sizes = [8, 128], strides = [1, 1]} : vector<10x128xbf16> to vector<8x128xbf16>
    %161 = vector.extract_strided_slice %159 {offsets = [1, 0], sizes = [8, 128], strides = [1, 1]} : vector<10x128xbf16> to vector<8x128xbf16>
    %162 = vector.extract_strided_slice %159 {offsets = [2, 0], sizes = [8, 128], strides = [1, 1]} : vector<10x128xbf16> to vector<8x128xbf16>
    %163 = tpu.concatenate %160, %161, %162 in 1 : vector<8x128xbf16>, vector<8x128xbf16>, vector<8x128xbf16> -> vector<8x384xbf16>
    %cst_51 = arith.constant 0.000000e+00 : bf16
    %164 = vector.broadcast %cst_51 : bf16 to vector<1x128xbf16>
    %165 = tpu.concatenate %164, %100, %164 in 0 : vector<1x128xbf16>, vector<8x128xbf16>, vector<1x128xbf16> -> vector<10x128xbf16>
    %166 = vector.extract_strided_slice %165 {offsets = [0, 0], sizes = [8, 128], strides = [1, 1]} : vector<10x128xbf16> to vector<8x128xbf16>
    %167 = vector.extract_strided_slice %165 {offsets = [1, 0], sizes = [8, 128], strides = [1, 1]} : vector<10x128xbf16> to vector<8x128xbf16>
    %168 = vector.extract_strided_slice %165 {offsets = [2, 0], sizes = [8, 128], strides = [1, 1]} : vector<10x128xbf16> to vector<8x128xbf16>
    %169 = tpu.concatenate %166, %167, %168 in 1 : vector<8x128xbf16>, vector<8x128xbf16>, vector<8x128xbf16> -> vector<8x384xbf16>
    %170 = tpu.concatenate %163, %169 in 1 : vector<8x384xbf16>, vector<8x384xbf16> -> vector<8x768xbf16>
    %cst_52 = arith.constant dense<0.000000e+00> : vector<8x128xf32>
    %171 = tpu.matmul %170, %152, %cst_52 {dimension_numbers = #tpu.dot_dimension_numbers<[1], [0], [0], [1], [0, 0, 1, 1], [], []>} : vector<8x768xbf16>, vector<768x128xbf16>, vector<8x128xf32> -> vector<8x128xf32>
    %172 = vector.extract_strided_slice %153 {offsets = [0, 0], sizes = [1, 128], strides = [1, 1]} : vector<3x128xf32> to vector<1x128xf32>
    %173 = vector.broadcast %172 : vector<1x128xf32> to vector<8x128xf32>
    %174 = arith.addf %171, %173 : vector<8x128xf32>
    %175 = vector.extract_strided_slice %153 {offsets = [1, 0], sizes = [1, 128], strides = [1, 1]} : vector<3x128xf32> to vector<1x128xf32>
    %176 = vector.extract_strided_slice %153 {offsets = [2, 0], sizes = [1, 128], strides = [1, 1]} : vector<3x128xf32> to vector<1x128xf32>
    %177 = tpu.iota {dimensions = array<i32: 1>} : vector<1x128xi32>
    %c8_i32_53 = arith.constant 8 : i32
    %178 = vector.broadcast %c8_i32_53 : i32 to vector<1x128xi32>
    %179 = arith.cmpi slt, %177, %178 : vector<1x128xi32>
    %180 = arith.extui %179 : vector<1x128xi1> to vector<1x128xi32>
    %181 = arith.sitofp %180 : vector<1x128xi32> to vector<1x128xf32>
    %cst_54 = arith.constant dense<0.000000e+00> : vector<8xf32>
    %182 = vector.multi_reduction <add>, %174, %cst_54 [1] : vector<8x128xf32> to vector<8xf32>
    %183 = vector.shape_cast %182 : vector<8xf32> to vector<8x1xf32>
    %cst_55 = arith.constant dense<0.000000e+00> : vector<1xf32>
    %184 = vector.multi_reduction <add>, %183, %cst_55 [0] : vector<8x1xf32> to vector<1xf32>
    %185 = vector.shape_cast %184 : vector<1xf32> to vector<1x1xf32>
    %cst_56 = arith.constant 6.400000e+01 : f32
    %186 = vector.broadcast %cst_56 : f32 to vector<1x1xf32>
    %187 = arith.divf %185, %186 : vector<1x1xf32>
    %188 = vector.broadcast %187 : vector<1x1xf32> to vector<8x128xf32>
    %189 = arith.subf %174, %188 : vector<8x128xf32>
    %190 = vector.broadcast %181 : vector<1x128xf32> to vector<8x128xf32>
    %191 = arith.mulf %189, %190 : vector<8x128xf32>
    %192 = arith.mulf %191, %191 : vector<8x128xf32>
    %cst_57 = arith.constant dense<0.000000e+00> : vector<8xf32>
    %193 = vector.multi_reduction <add>, %192, %cst_57 [1] : vector<8x128xf32> to vector<8xf32>
    %194 = vector.shape_cast %193 : vector<8xf32> to vector<8x1xf32>
    %cst_58 = arith.constant dense<0.000000e+00> : vector<1xf32>
    %195 = vector.multi_reduction <add>, %194, %cst_58 [0] : vector<8x1xf32> to vector<1xf32>
    %196 = vector.shape_cast %195 : vector<1xf32> to vector<1x1xf32>
    %cst_59 = arith.constant 6.400000e+01 : f32
    %197 = vector.broadcast %cst_59 : f32 to vector<1x1xf32>
    %198 = arith.divf %196, %197 : vector<1x1xf32>
    %cst_60 = arith.constant 9.99999974E-6 : f32
    %199 = vector.broadcast %cst_60 : f32 to vector<1x1xf32>
    %200 = arith.addf %198, %199 : vector<1x1xf32>
    %201 = math.rsqrt %200 : vector<1x1xf32>
    %202 = vector.broadcast %201 : vector<1x1xf32> to vector<8x128xf32>
    %203 = arith.mulf %191, %202 : vector<8x128xf32>
    %204 = vector.broadcast %175 : vector<1x128xf32> to vector<8x128xf32>
    %205 = arith.mulf %203, %204 : vector<8x128xf32>
    %206 = vector.broadcast %176 : vector<1x128xf32> to vector<8x128xf32>
    %207 = arith.addf %205, %206 : vector<8x128xf32>
    %cst_61 = arith.constant 0.000000e+00 : f32
    %208 = vector.broadcast %cst_61 : f32 to vector<8x128xf32>
    %209 = arith.maximumf %207, %208 : vector<8x128xf32>
    %210 = arith.truncf %209 : vector<8x128xf32> to vector<8x128xbf16>
    %c0_62 = arith.constant 0 : index
    %c0_63 = arith.constant 0 : index
    %211 = vector.load %arg10[%c0_62, %c0_63] : memref<768x128xbf16, #tpu.memory_space<vmem>>, vector<768x128xbf16>
    %c0_64 = arith.constant 0 : index
    %c0_65 = arith.constant 0 : index
    %212 = vector.load %arg11[%c0_64, %c0_65] : memref<3x128xf32, #tpu.memory_space<vmem>>, vector<3x128xf32>
    %213 = vector.shape_cast %210 : vector<8x128xbf16> to vector<8x1x128xbf16>
    %214 = vector.shape_cast %213 : vector<8x1x128xbf16> to vector<8x1x128xbf16>
    %215 = vector.broadcast %214 : vector<8x1x128xbf16> to vector<8x2x128xbf16>
    %216 = vector.shape_cast %215 : vector<8x2x128xbf16> to vector<16x128xbf16>
    %cst_66 = arith.constant 0.000000e+00 : bf16
    %217 = vector.broadcast %cst_66 : bf16 to vector<1x128xbf16>
    %218 = tpu.concatenate %217, %216, %217 in 0 : vector<1x128xbf16>, vector<16x128xbf16>, vector<1x128xbf16> -> vector<18x128xbf16>
    %219 = vector.extract_strided_slice %218 {offsets = [0, 0], sizes = [16, 128], strides = [1, 1]} : vector<18x128xbf16> to vector<16x128xbf16>
    %220 = vector.extract_strided_slice %218 {offsets = [1, 0], sizes = [16, 128], strides = [1, 1]} : vector<18x128xbf16> to vector<16x128xbf16>
    %221 = vector.extract_strided_slice %218 {offsets = [2, 0], sizes = [16, 128], strides = [1, 1]} : vector<18x128xbf16> to vector<16x128xbf16>
    %222 = tpu.concatenate %219, %220, %221 in 1 : vector<16x128xbf16>, vector<16x128xbf16>, vector<16x128xbf16> -> vector<16x384xbf16>
    %cst_67 = arith.constant 0.000000e+00 : bf16
    %223 = vector.broadcast %cst_67 : bf16 to vector<1x128xbf16>
    %224 = tpu.concatenate %223, %49, %223 in 0 : vector<1x128xbf16>, vector<16x128xbf16>, vector<1x128xbf16> -> vector<18x128xbf16>
    %225 = vector.extract_strided_slice %224 {offsets = [0, 0], sizes = [16, 128], strides = [1, 1]} : vector<18x128xbf16> to vector<16x128xbf16>
    %226 = vector.extract_strided_slice %224 {offsets = [1, 0], sizes = [16, 128], strides = [1, 1]} : vector<18x128xbf16> to vector<16x128xbf16>
    %227 = vector.extract_strided_slice %224 {offsets = [2, 0], sizes = [16, 128], strides = [1, 1]} : vector<18x128xbf16> to vector<16x128xbf16>
    %228 = tpu.concatenate %225, %226, %227 in 1 : vector<16x128xbf16>, vector<16x128xbf16>, vector<16x128xbf16> -> vector<16x384xbf16>
    %229 = tpu.concatenate %222, %228 in 1 : vector<16x384xbf16>, vector<16x384xbf16> -> vector<16x768xbf16>
    %cst_68 = arith.constant dense<0.000000e+00> : vector<16x128xf32>
    %230 = tpu.matmul %229, %211, %cst_68 {dimension_numbers = #tpu.dot_dimension_numbers<[1], [0], [0], [1], [0, 0, 1, 1], [], []>} : vector<16x768xbf16>, vector<768x128xbf16>, vector<16x128xf32> -> vector<16x128xf32>
    %231 = vector.extract_strided_slice %212 {offsets = [0, 0], sizes = [1, 128], strides = [1, 1]} : vector<3x128xf32> to vector<1x128xf32>
    %232 = vector.broadcast %231 : vector<1x128xf32> to vector<16x128xf32>
    %233 = arith.addf %230, %232 : vector<16x128xf32>
    %234 = vector.extract_strided_slice %212 {offsets = [1, 0], sizes = [1, 128], strides = [1, 1]} : vector<3x128xf32> to vector<1x128xf32>
    %235 = vector.extract_strided_slice %212 {offsets = [2, 0], sizes = [1, 128], strides = [1, 1]} : vector<3x128xf32> to vector<1x128xf32>
    %236 = tpu.iota {dimensions = array<i32: 1>} : vector<1x128xi32>
    %c4_i32 = arith.constant 4 : i32
    %237 = vector.broadcast %c4_i32 : i32 to vector<1x128xi32>
    %238 = arith.cmpi slt, %236, %237 : vector<1x128xi32>
    %239 = arith.extui %238 : vector<1x128xi1> to vector<1x128xi32>
    %240 = arith.sitofp %239 : vector<1x128xi32> to vector<1x128xf32>
    %cst_69 = arith.constant dense<0.000000e+00> : vector<16xf32>
    %241 = vector.multi_reduction <add>, %233, %cst_69 [1] : vector<16x128xf32> to vector<16xf32>
    %242 = vector.shape_cast %241 : vector<16xf32> to vector<16x1xf32>
    %cst_70 = arith.constant dense<0.000000e+00> : vector<1xf32>
    %243 = vector.multi_reduction <add>, %242, %cst_70 [0] : vector<16x1xf32> to vector<1xf32>
    %244 = vector.shape_cast %243 : vector<1xf32> to vector<1x1xf32>
    %cst_71 = arith.constant 6.400000e+01 : f32
    %245 = vector.broadcast %cst_71 : f32 to vector<1x1xf32>
    %246 = arith.divf %244, %245 : vector<1x1xf32>
    %247 = vector.broadcast %246 : vector<1x1xf32> to vector<16x128xf32>
    %248 = arith.subf %233, %247 : vector<16x128xf32>
    %249 = vector.broadcast %240 : vector<1x128xf32> to vector<16x128xf32>
    %250 = arith.mulf %248, %249 : vector<16x128xf32>
    %251 = arith.mulf %250, %250 : vector<16x128xf32>
    %cst_72 = arith.constant dense<0.000000e+00> : vector<16xf32>
    %252 = vector.multi_reduction <add>, %251, %cst_72 [1] : vector<16x128xf32> to vector<16xf32>
    %253 = vector.shape_cast %252 : vector<16xf32> to vector<16x1xf32>
    %cst_73 = arith.constant dense<0.000000e+00> : vector<1xf32>
    %254 = vector.multi_reduction <add>, %253, %cst_73 [0] : vector<16x1xf32> to vector<1xf32>
    %255 = vector.shape_cast %254 : vector<1xf32> to vector<1x1xf32>
    %cst_74 = arith.constant 6.400000e+01 : f32
    %256 = vector.broadcast %cst_74 : f32 to vector<1x1xf32>
    %257 = arith.divf %255, %256 : vector<1x1xf32>
    %cst_75 = arith.constant 9.99999974E-6 : f32
    %258 = vector.broadcast %cst_75 : f32 to vector<1x1xf32>
    %259 = arith.addf %257, %258 : vector<1x1xf32>
    %260 = math.rsqrt %259 : vector<1x1xf32>
    %261 = vector.broadcast %260 : vector<1x1xf32> to vector<16x128xf32>
    %262 = arith.mulf %250, %261 : vector<16x128xf32>
    %263 = vector.broadcast %234 : vector<1x128xf32> to vector<16x128xf32>
    %264 = arith.mulf %262, %263 : vector<16x128xf32>
    %265 = vector.broadcast %235 : vector<1x128xf32> to vector<16x128xf32>
    %266 = arith.addf %264, %265 : vector<16x128xf32>
    %cst_76 = arith.constant 0.000000e+00 : f32
    %267 = vector.broadcast %cst_76 : f32 to vector<16x128xf32>
    %268 = arith.maximumf %266, %267 : vector<16x128xf32>
    %269 = arith.truncf %268 : vector<16x128xf32> to vector<16x128xbf16>
    %c0_77 = arith.constant 0 : index
    %c0_78 = arith.constant 0 : index
    %270 = vector.load %arg12[%c0_77, %c0_78] : memref<384x128xbf16, #tpu.memory_space<vmem>>, vector<384x128xbf16>
    %c0_79 = arith.constant 0 : index
    %c0_80 = arith.constant 0 : index
    %271 = vector.load %arg13[%c0_79, %c0_80] : memref<1x128xf32, #tpu.memory_space<vmem>>, vector<1x128xf32>
    %cst_81 = arith.constant 0.000000e+00 : bf16
    %272 = vector.broadcast %cst_81 : bf16 to vector<1x128xbf16>
    %273 = tpu.concatenate %272, %269, %272 in 0 : vector<1x128xbf16>, vector<16x128xbf16>, vector<1x128xbf16> -> vector<18x128xbf16>
    %274 = vector.extract_strided_slice %273 {offsets = [0, 0], sizes = [16, 128], strides = [1, 1]} : vector<18x128xbf16> to vector<16x128xbf16>
    %275 = vector.extract_strided_slice %273 {offsets = [1, 0], sizes = [16, 128], strides = [1, 1]} : vector<18x128xbf16> to vector<16x128xbf16>
    %276 = vector.extract_strided_slice %273 {offsets = [2, 0], sizes = [16, 128], strides = [1, 1]} : vector<18x128xbf16> to vector<16x128xbf16>
    %277 = tpu.concatenate %274, %275, %276 in 1 : vector<16x128xbf16>, vector<16x128xbf16>, vector<16x128xbf16> -> vector<16x384xbf16>
    %cst_82 = arith.constant dense<0.000000e+00> : vector<16x128xf32>
    %278 = tpu.matmul %277, %270, %cst_82 {dimension_numbers = #tpu.dot_dimension_numbers<[1], [0], [0], [1], [0, 0, 1, 1], [], []>} : vector<16x384xbf16>, vector<384x128xbf16>, vector<16x128xf32> -> vector<16x128xf32>
    %279 = vector.broadcast %271 : vector<1x128xf32> to vector<16x128xf32>
    %280 = arith.addf %278, %279 : vector<16x128xf32>
    %c0_83 = arith.constant 0 : index
    %c0_84 = arith.constant 0 : index
    %c0_85 = arith.constant 0 : index
    %281 = vector.load %arg14[%c0_83, %c0_84, %c0_85] : memref<1x16x128xf32, #tpu.memory_space<vmem>>, vector<1x16x128xf32>
    %282 = vector.shape_cast %281 : vector<1x16x128xf32> to vector<16x128xf32>
    %283 = vector.shape_cast %280 : vector<16x128xf32> to vector<1x16x128xf32>
    tpu.vector_store %arg14[%c0_83, %c0_84, %c0_85], %283 {strides = array<i32>} : memref<1x16x128xf32, #tpu.memory_space<vmem>>, vector<1x16x128xf32>,
    return
  }
  func.func @transform_0(%arg0: i32) -> (i32, i32, i32) {
    %c0_i32 = arith.constant 0 : i32
    %c0_i32_0 = arith.constant 0 : i32
    %c0_i32_1 = arith.constant 0 : i32
    return %arg0, %c0_i32, %c0_i32_0 : i32, i32, i32
  }
  func.func @transform_1(%arg0: i32) -> (i32, i32) {
    %c0_i32 = arith.constant 0 : i32
    %c0_i32_0 = arith.constant 0 : i32
    %c0_i32_1 = arith.constant 0 : i32
    return %c0_i32, %c0_i32_0 : i32, i32
  }
  func.func @transform_2(%arg0: i32) -> (i32, i32) {
    %c0_i32 = arith.constant 0 : i32
    %c0_i32_0 = arith.constant 0 : i32
    %c0_i32_1 = arith.constant 0 : i32
    return %c0_i32, %c0_i32_0 : i32, i32
  }
  func.func @transform_3(%arg0: i32) -> (i32, i32) {
    %c0_i32 = arith.constant 0 : i32
    %c0_i32_0 = arith.constant 0 : i32
    %c0_i32_1 = arith.constant 0 : i32
    return %c0_i32, %c0_i32_0 : i32, i32
  }
  func.func @transform_4(%arg0: i32) -> (i32, i32) {
    %c0_i32 = arith.constant 0 : i32
    %c0_i32_0 = arith.constant 0 : i32
    %c0_i32_1 = arith.constant 0 : i32
    return %c0_i32, %c0_i32_0 : i32, i32
  }
  func.func @transform_5(%arg0: i32) -> (i32, i32) {
    %c0_i32 = arith.constant 0 : i32
    %c0_i32_0 = arith.constant 0 : i32
    %c0_i32_1 = arith.constant 0 : i32
    return %c0_i32, %c0_i32_0 : i32, i32
  }
  func.func @transform_6(%arg0: i32) -> (i32, i32) {
    %c0_i32 = arith.constant 0 : i32
    %c0_i32_0 = arith.constant 0 : i32
    %c0_i32_1 = arith.constant 0 : i32
    return %c0_i32, %c0_i32_0 : i32, i32
  }
  func.func @transform_7(%arg0: i32) -> (i32, i32) {
    %c0_i32 = arith.constant 0 : i32
    %c0_i32_0 = arith.constant 0 : i32
    %c0_i32_1 = arith.constant 0 : i32
    return %c0_i32, %c0_i32_0 : i32, i32
  }
  func.func @transform_8(%arg0: i32) -> (i32, i32) {
    %c0_i32 = arith.constant 0 : i32
    %c0_i32_0 = arith.constant 0 : i32
    %c0_i32_1 = arith.constant 0 : i32
    return %c0_i32, %c0_i32_0 : i32, i32
  }
  func.func @transform_9(%arg0: i32) -> (i32, i32) {
    %c0_i32 = arith.constant 0 : i32
    %c0_i32_0 = arith.constant 0 : i32
    %c0_i32_1 = arith.constant 0 : i32
    return %c0_i32, %c0_i32_0 : i32, i32
  }
  func.func @transform_10(%arg0: i32) -> (i32, i32) {
    %c0_i32 = arith.constant 0 : i32
    %c0_i32_0 = arith.constant 0 : i32
    %c0_i32_1 = arith.constant 0 : i32
    return %c0_i32, %c0_i32_0 : i32, i32
  }
  func.func @transform_11(%arg0: i32) -> (i32, i32) {
    %c0_i32 = arith.constant 0 : i32
    %c0_i32_0 = arith.constant 0 : i32
    %c0_i32_1 = arith.constant 0 : i32
    return %c0_i32, %c0_i32_0 : i32, i32
  }
  func.func @transform_12(%arg0: i32) -> (i32, i32) {
    %c0_i32 = arith.constant 0 : i32
    %c0_i32_0 = arith.constant 0 : i32
    %c0_i32_1 = arith.constant 0 : i32
    return %c0_i32, %c0_i32_0 : i32, i32
  }
  func.func @transform_13(%arg0: i32) -> (i32, i32, i32) {
    %c0_i32 = arith.constant 0 : i32
    %c0_i32_0 = arith.constant 0 : i32
    %c0_i32_1 = arith.constant 0 : i32
    return %arg0, %c0_i32, %c0_i32_0 : i32, i32, i32
  }
}

</mosaic_0001>

<bundles_post_ra>
// kernel: tpu_custom_call.1
= control target key start
LH: loop header
LB: loop body
LE: loop exit
PB: predicated region body
PF: predicated region fallthrough
CT: control target
= control target key end

     0   :  { %s5624_s0 = inlined_call_operand.hbm [shape: bf16[2,16,128], index: 0, kind: input, shape index: {}]   ;;  %s5625_s1 = inlined_call_operand.hbm [shape: bf16[384,128], index: 1, kind: input, shape index: {}]   ;;  %s5626_s2 = inlined_call_operand.hbm [shape: f32[3,128], index: 2, kind: input, shape index: {}]   ;;  %s5627_s3 = inlined_call_operand.hbm [shape: bf16[384,128], index: 3, kind: input, shape index: {}]   ;;  %s5628_s4 = inlined_call_operand.vmem [shape: f32[3,128], index: 4, kind: input, shape index: {}]   ;;  %s5629_s5 = inlined_call_operand.hbm [shape: bf16[384,128], index: 5, kind: input, shape index: {}]   ;;  %s5630_s6 = inlined_call_operand.vmem [shape: f32[3,128], index: 6, kind: input, shape index: {}]   ;;  %s5631_s7 = inlined_call_operand.hbm [shape: bf16[768,128], index: 7, kind: input, shape index: {}]   ;;  %s5632_s8 = inlined_call_operand.vmem [shape: f32[3,128], index: 8, kind: input, shape index: {}]   ;;  %s5633_s9 = inlined_call_operand.hbm [shape: bf16[768,128], index: 9, kind: input, shape index: {}]   ;;  %s5634_s10 = inlined_call_operand.vmem [shape: f32[3,128], index: 10, kind: input, shape index: {}]   ;;  %s5635_s11 = inlined_call_operand.hbm [shape: bf16[384,128], index: 11, kind: input, shape index: {}]   ;;  %s5636_s12 = inlined_call_operand.vmem [shape: f32[1,128], index: 12, kind: input, shape index: {}]   ;;  %s5637_s13 = inlined_call_operand.hbm [shape: f32[2,16,128], index: 13, kind: output, shape index: {}]  }
   0x1   :  { %5644 = sst [smem:[#allocation23_spill]] %s5625_s1 }
   0x2   :  { %5645 = sst [smem:[#allocation24_spill]] %s5626_s2 }
   0x3   :  { %5646 = sst [smem:[#allocation25_spill]] %s5627_s3 }
   0x4   :  { %5647 = sst [smem:[#allocation26_spill]] %s5629_s5 }
   0x5   :  { %5648 = sst [smem:[#allocation27_spill]] %s5631_s7 }
   0x6   :  { %5649 = sst [smem:[#allocation28_spill]] %s5633_s9 }
   0x7   :  { %5650 = sst [smem:[#allocation29_spill]] %s5635_s11 }
   0x8   :  { %18 = vsyncpa [#allocation3], 0 }
   0x9   :  { %20 = vsyncpa [#allocation3 + $0x1], 0 }
   0xa   :  { %21 = vsyncpa [#allocation6], 0 }
   0xb   :  { %22 = vsyncpa [#allocation9], 0 }
   0xc   :  { %23 = vsyncpa [#allocation12], 0 }
   0xd   :  { %24 = vsyncpa [#allocation15], 0 }
   0xe   :  { %25 = vsyncpa [#allocation4], 0 }
   0xf   :  { %27 = vsyncpa [#allocation4 + $0x1], 0  ;;  %s5052_s25 = smov 0   ;;  %s5054_s26 = smov 0  }
  0x10   :  { %s5056_s27 = smov 0   ;;  %s5058_s28 = smov 0  }
  0x11 LB: > { %s4965_s29 = smov [#allocation5]   ;;  %s5073_s14 = sadd.s32 4294967295, %s4963_s28   ;;  %s4963_s28 = sphi %s5058_s28, %s5688_s28   ;;  %s4959_s27 = sphi %s5056_s27, %s5687_s27   ;;  %s4955_s26 = sphi %s5054_s26, %s5686_s26   ;;  %s4951_s25 = sphi %s5052_s25, %s5685_s25  }
  0x12   : > { %s354_s30 = sshll.u32 %s4965_s29, 4  ;;  %p3777_p0 = scmp.ge.s32.totalorder %s4963_s28, 1  ;;  %s355_s30 = int_to_ptr.vmem [resolvable:$true] %s354_s30 }
  0x13   : > { %p5638_p1 = scmp.eq.s32.totalorder %s5073_s14, 0  ;;  %p342_p2 = scmp.lt.s32.totalorder %s4963_s28, 3 }
  0x14   : > { %s4966_s16 = smov [#allocation8]   ;;  %s4967_s19 = smov [#allocation11]  }
  0x15   : > { %p5078_p3 = pnand %p3777_p0, %p342_p2  ;;  %s378_s17 = sshll.u32 %s4966_s16, 4  ;;  %s5091_s17 = int_to_ptr.vmem [resolvable:$true] %s378_s17 }
  0x16   : > { %s410_s20 = sshll.u32 %s4967_s19, 4  ;;  %s4684_s22 = scalar_lea.vmem %s355_s30, 3072  ;;  %s5093_s20 = int_to_ptr.vmem [resolvable:$true] %s410_s20 }
  0x17   : > { %s5651_s15 = scalar_select %p5078_p3, 1, 0 }
  0x18   : > { %p4377_p5 = pneg %p5078_p3  ;;  %p4685_p8 = scmp.ne.s32.totalorder %s355_s30, %s4684_s22 }
  0x19   : > { %p4692_p11 = scmp.lt.s32.totalorder %s355_s30, %s355_s30  ;;  %p4693_p12 = scmp.lt.s32.totalorder %s4684_s22, %s4684_s22 }
  0x1a   : > { %p5087_p6 = pnand %p4377_p5, %p5638_p1 }
  0x1b   : > { %p4694_p13 = por %p4693_p12, %p4692_p11 }
  0x1c   : > { %p5097_p7 = pneg %p5087_p6 }
  0x1e   : > { %p4687_p9 = pnand %p4685_p8, %p5097_p7 }
  0x20   : > { %p4688_p10 = pneg %p4687_p9 }
  0x22   : > { %p4695_p0 = pnand %p4694_p13, %p4688_p10 }
  0x24   : > { %4698 = shalt.err (!%p4695_p0)
}
  0x25   : > { %s5640_s23 = smov 64   ;;  %s5641_s24 = smov 4  }
  0x26   : > { %s5654_s1 = sld [smem:[#allocation23_spill]]  ;;  %s4710_s19 = scalar_lea.vmem %s5091_s17, 3072 }
  0x27   : > { %p4711_p2 = scmp.ne.s32.totalorder %s5091_s17, %s4710_s19  ;;  %p4718_p9 = scmp.lt.s32.totalorder %s5091_s17, %s5091_s17 }
  0x28   : > { %p4719_p10 = scmp.lt.s32.totalorder %s4710_s19, %s4710_s19 }
  0x29   : > { %p4713_p5 = pnand %p4711_p2, %p5097_p7 }
  0x2a   : > { %p4720_p11 = por %p4719_p10, %p4718_p9 }
  0x2b   : > { %p4714_p8 = pneg %p4713_p5 }
  0x2c   : > { %4380 = dma.hbm_to_vmem [thread:$0]  (!%p5087_p6), %s5654_s1, 3072, %s355_s30, [#allocation6], %s5640_s23, %s5640_s23, %s5641_s24  }
  0x2d   : > { %p4721_p12 = pnand %p4720_p11, %p4714_p8 }
  0x2f   : > { %4724 = shalt.err (!%p4721_p12)
}
  0x30   : > { %s5655_s3 = sld [smem:[#allocation25_spill]]  ;;  %s4736_s30 = scalar_lea.vmem %s5093_s20, 6144 }
  0x31   : > { %p4737_p13 = scmp.ne.s32.totalorder %s5093_s20, %s4736_s30  ;;  %p4744_p5 = scmp.lt.s32.totalorder %s5093_s20, %s5093_s20 }
  0x32   : > { %p4745_p8 = scmp.lt.s32.totalorder %s4736_s30, %s4736_s30 }
  0x33   : > { %p4739_p0 = pnand %p4737_p13, %p5097_p7 }
  0x34   : > { %p4746_p9 = por %p4745_p8, %p4744_p5 }
  0x35   : > { %p4740_p2 = pneg %p4739_p0 }
  0x36   : > { %4386 = dma.hbm_to_vmem [thread:$0]  (!%p5087_p6), %s5655_s3, 3072, %s5091_s17, [#allocation9], %s5640_s23, %s5640_s23, %s5641_s24  }
  0x37   : > { %p4747_p10 = pnand %p4746_p9, %p4740_p2 }
  0x39   : > { %4750 = shalt.err (!%p4747_p10)
}
  0x3a   : > { %s5656_s7 = sld [smem:[#allocation27_spill]]  ;;  %s4970_s17 = smov [#allocation7]  }
  0x3b   : > { %s368_s22 = sshll.u32 %s4970_s17, 4  ;;  %s4971_s29 = smov [#allocation10]   ;;  %s369_s22 = int_to_ptr.vmem [resolvable:$true] %s368_s22 }
  0x3c   : > { %s394_s1 = sshll.u32 %s4971_s29, 4  ;;  %s4762_s30 = scalar_lea.vmem %s369_s22, 64  ;;  %s395_s1 = int_to_ptr.vmem [resolvable:$true] %s394_s1 }
  0x3d   : > { %p4763_p11 = scmp.ne.s32.totalorder %s369_s22, %s4762_s30  ;;  %p4770_p0 = scmp.lt.s32.totalorder %s369_s22, %s369_s22 }
  0x3e   : > { %p4771_p2 = scmp.lt.s32.totalorder %s4762_s30, %s4762_s30 }
  0x3f   : > { %p4765_p12 = pnand %p4763_p11, %p5097_p7 }
  0x40   : > { %4392 = dma.hbm_to_vmem [thread:$0]  (!%p5087_p6), %s5656_s7, 6144, %s5093_s20, [#allocation12], %s5640_s23, %s5640_s23, %s5641_s24  }
  0x41   : > { %p4766_p13 = pneg %p4765_p12  ;;  %p4772_p5 = por %p4771_p2, %p4770_p0 }
  0x43   : > { %p4773_p8 = pnand %p4772_p5, %p4766_p13 }
  0x45   : > { %4776 = shalt.err (!%p4773_p8)
}
  0x46   : > { %s5657_s2 = sld [smem:[#allocation24_spill]]  ;;  %s4788_s20 = scalar_lea.vmem %s395_s1, 3072 }
  0x47   : > { %p4789_p9 = scmp.ne.s32.totalorder %s395_s1, %s4788_s20  ;;  %p4796_p11 = scmp.lt.s32.totalorder %s395_s1, %s395_s1 }
  0x48   : > { %p4797_p12 = scmp.lt.s32.totalorder %s4788_s20, %s4788_s20 }
  0x49   : > { %p4791_p10 = pnand %p4789_p9, %p5097_p7 }
  0x4a   : > { %p4798_p1 = por %p4797_p12, %p4796_p11 }
  0x4b   : > { %p4792_p4 = pneg %p4791_p10 }
  0x4c   : > { %4383 = dma.hbm_to_vmem [thread:$0]  (!%p5087_p6), %s5657_s2, 64, %s369_s22, [#allocation6]  }
  0x4d   : > { %p4799_p3 = pnand %p4798_p1, %p4792_p4 }
  0x4f   : > { %4802 = shalt.err (!%p4799_p3)
}
  0x50   : > { %s5658_s5 = sld [smem:[#allocation26_spill]]  ;;  %s4972_s22 = smov [#allocation13]  }
  0x51   : > { %s426_s30 = sshll.u32 %s4972_s22, 4  ;;  %s4973_s16 = smov [#allocation14]   ;;  %s427_s30 = int_to_ptr.vmem [resolvable:$true] %s426_s30 }
  0x52   : > { %s442_s19 = sshll.u32 %s4973_s16, 4  ;;  %s4814_s2 = scalar_lea.vmem %s427_s30, 6144  ;;  %s443_s19 = int_to_ptr.vmem [resolvable:$true] %s442_s19 }
  0x53   : > { %p4815_p13 = scmp.ne.s32.totalorder %s427_s30, %s4814_s2  ;;  %p4822_p4 = scmp.lt.s32.totalorder %s427_s30, %s427_s30 }
  0x54   : > { %p4823_p0 = scmp.lt.s32.totalorder %s4814_s2, %s4814_s2 }
  0x55   : > { %p4817_p1 = pnand %p4815_p13, %p5097_p7 }
  0x56   : > { %4389 = dma.hbm_to_vmem [thread:$0]  (!%p5087_p6), %s5658_s5, 3072, %s395_s1, [#allocation9], %s5640_s23, %s5640_s23, %s5641_s24  }
  0x57   : > { %p4818_p3 = pneg %p4817_p1  ;;  %p4824_p2 = por %p4823_p0, %p4822_p4 }
  0x59   : > { %p4825_p5 = pnand %p4824_p2, %p4818_p3 }
  0x5b   : > { %4828 = shalt.err (!%p4825_p5)
}
  0x5c   : > { %s5659_s9 = sld [smem:[#allocation28_spill]]  ;;  %s4840_s17 = scalar_lea.vmem %s443_s19, 3072 }
  0x5d   : > { %p4841_p8 = scmp.ne.s32.totalorder %s443_s19, %s4840_s17  ;;  %p4848_p11 = scmp.lt.s32.totalorder %s443_s19, %s443_s19 }
  0x5e   : > { %p4849_p12 = scmp.lt.s32.totalorder %s4840_s17, %s4840_s17 }
  0x5f   : > { %p4843_p9 = pnand %p4841_p8, %p5097_p7 }
  0x60   : > { %p4850_p13 = por %p4849_p12, %p4848_p11 }
  0x61   : > { %p4844_p10 = pneg %p4843_p9 }
  0x62   : > { %4395 = dma.hbm_to_vmem [thread:$0]  (!%p5087_p6), %s5659_s9, 6144, %s427_s30, [#allocation12], %s5640_s23, %s5640_s23, %s5641_s24  }
  0x63   : > { %p4851_p1 = pnand %p4850_p13, %p4844_p10 }
  0x65   : > { %4854 = shalt.err (!%p4851_p1)
}
  0x66   : > { %s5660_s11 = sld [smem:[#allocation29_spill]]  ;;  %s3776_s18 = sadd.s32 4294967294, %s4963_s28  }
  0x67   : > { %s5180_s21 = sadd.s32 1, %s4963_s28   ;;  %s40_s22 = sadd.s32 1, %s4959_s27 }
  0x68   : > { %s37_s30 = ssub.s32 %s4963_s28, %s5180_s21  ;;  %p47_p7 = scmp.ne.s32.totalorder %s4959_s27, %s4955_s26 }
  0x69   : > { %p38_p3 = scmp.eq.s32.totalorder %s37_s30, 0  ;;  %p48_p4 = scmp.eq.s32.totalorder %s4963_s28, 0 }
  0x6a   : > { %p53_p0 = scmp.ne.s32.totalorder %s4955_s26, %s4951_s25  ;;  %p329_p2 = scmp.eq.s32.totalorder %s5073_s14, 1 }
  0x6b   : > { %s5192_s16 = scalar_select %p38_p3, %s4959_s27, %s40_s22  }
  0x6c   : > { %4398 = dma.hbm_to_vmem [thread:$0]  (!%p5087_p6), %s5660_s11, 3072, %s443_s19, [#allocation15], %s5640_s23, %s5640_s23, %s5641_s24  }
  0x6d   : > { %p49_p5 = por %p48_p4, %p47_p7  ;;  %p5661_p8 = scmp.eq.s32.totalorder %s5073_s14, 0 }
  0x6e   : > { %p5200_p6 = por %p329_p2, %p47_p7  ;;  %p335_p10 = scmp.eq.s32.totalorder %s3776_s18, 1 }
  0x6f   : > { %p5196_p9 = por %p5661_p8, %p53_p0  ;;  %p4414_p11 = scmp.lt.s32.totalorder %s4963_s28, 2 }
  0x70   : > { %s5663_s19 = scalar_select %p5200_p6, 1, 0 }
  0x71   : > { %s5662_s1 = scalar_select %p5196_p9, 1, 0 }
  0x72   : > { %s459_s20 = sand.u32 1, %s4959_s27   ;;  %p5206_p12 = por %p335_p10, %p53_p0 }
  0x73   : > { %s3786_s2 = sshll.u32 %s459_s20, 3  ;;  %s4007_s29 = sshll.u32 %s4963_s28, 7 }
  0x74   : > { %s5664_s17 = scalar_select %p5206_p12, 1, 0 }
  0x75   : > { %s5214_s23 = scalar_lea.hbm %s5624_s0, %s4007_s29  ;;  %s463_s24 = scalar_lea.vmem [#allocation2], %s3786_s2 }
  0x76   : > { %s470_s3 = sshll.u32 %s463_s24, 4  ;;  %p5216_p13 = pnand %p4414_p11, %p49_p5  ;;  %s5220_s3 = int_to_ptr.vmem [resolvable:$true] %s470_s3 }
  0x77   : > { %s5222_s5 = scalar_lea.sflag [#allocation3], %s459_s20  ;;  %s4855_s7 = scalar_lea.hbm %s5214_s23, 128 }
  0x78   : > { %p4856_p1 = scmp.ne.s32.totalorder %s5214_s23, %s4855_s7  ;;  %p4857_p7 = pneg %p5216_p13 }
  0x79   : > { %s4860_s2 = scalar_lea.hbm %s5624_s0, 256  ;;  %p4861_p0 = scmp.lt.s32.totalorder %s5214_s23, %s5624_s0 }
  0x7a   : > { %p4858_p3 = pnand %p4857_p7, %p4856_p1  ;;  %p4862_p2 = scmp.lt.s32.totalorder %s4860_s2, %s4855_s7 }
  0x7c   : > { %p4859_p4 = pneg %p4858_p3  ;;  %p4863_p5 = por %p4862_p2, %p4861_p0 }
  0x7e   : > { %p4864_p8 = pnand %p4863_p5, %p4859_p4 }
  0x80   : > { %4867 = shalt.err (!%p4864_p8)
}
  0x81   : > { %s4868_s20 = scalar_lea.vmem %s5220_s3, 128  ;;  %s4974_s9 = smov [#allocation2]  }
  0x82   : > { %p4869_p10 = scmp.ne.s32.totalorder %s5220_s3, %s4868_s20  ;;  %s4873_s11 = sshll.u32 %s4974_s9, 4  ;;  %s4874_s11 = int_to_ptr.vmem [resolvable:$false] %s4873_s11 }
  0x83   : > { %s4875_s29 = scalar_lea.vmem %s4874_s11, 256  ;;  %p4876_p3 = scmp.lt.s32.totalorder %s5220_s3, %s4874_s11 }
  0x84   : > { %p4871_p11 = pnand %p4869_p10, %p4857_p7  ;;  %p4877_p12 = scmp.lt.s32.totalorder %s4875_s29, %s4868_s20 }
  0x86   : > { %p4872_p1 = pneg %p4871_p11  ;;  %p4878_p6 = por %p4877_p12, %p4876_p3 }
  0x88   : > { %p4879_p9 = pnand %p4878_p6, %p4872_p1 }
  0x8a   : > { %4882 = shalt.err (!%p4879_p9)
}
  0x8b   : > { %s5666_s7 = smov 4   ;;  %s5667_s22 = smov 64  }
  0x8c   : > { %4402 = dma.hbm_to_vmem [thread:$0]  (!%p5216_p13), %s5214_s23, 128, %s5220_s3, %s5222_s5, %s5667_s22, %s5667_s22, %s5666_s7  }
  0x8d   : > { %p5668_p7 = scmp.ne.s32.totalorder %s5651_s15, 0 }
  0x8e   : > { %s5249_s9 = sand.u32 (!%p5668_p7), 1, %s4955_s26   ;;  %p5669_p9 = scmp.ne.s32.totalorder (!%p5668_p7), %s5662_s1, 0 }
  0x8f   : > { %482 = sbr.rel (%p5668_p7) target bundleno = 3350 (0xd16), region = 72  ;;  %s3790_s11 = sshll.u32 (!%p5668_p7), %s5249_s9, 3 }
  0x90   : > { %s485_s2 = scalar_lea.sflag (!%p5668_p7), [#allocation3], %s5249_s9  ;;  %s5253_s24 = scalar_lea.vmem (!%p5668_p7), [#allocation2], %s3790_s11 }
  0x94   : > { %4926 = dma.done.wait (%p5669_p9), %s485_s2, 128  }
  0x95   : > { %4928 = vsyncadd (%p5669_p9), %s485_s2, 4294967168  ;;  %p5670_p6 = scmp.eq.s32.totalorder %s5073_s14, 0 }
  0x97   : > { %4930 = dma.done.wait (%p5670_p6), [#allocation6], 3136   ;;  %p5671_p12 = pmov %p5670_p6 }
  0x98   : > { %p5672_p13 = pmov %p5670_p6 }
  0x99   : > { %4932 = vsyncadd (%p5671_p12), [#allocation6], 4294964160 }
  0x9a   : > { %4934 = dma.done.wait (%p5672_p13), [#allocation9], 6144   ;;  %p5673_p4 = pmov %p5670_p6 }
  0x9c   : > { %4936 = vsyncadd (%p5673_p4), [#allocation9], 4294961152  ;;  %p5674_p0 = pmov %p5673_p4 }
  0x9e   : > { %4938 = dma.done.wait (%p5674_p0), [#allocation12], 12288   ;;  %p5675_p2 = pmov %p5674_p0 }
  0x9f   : > { %p5676_p5 = pmov %p5674_p0 }
  0xa0   : > { %4940 = vsyncadd (%p5675_p2), [#allocation12], 4294955008 }
  0xa1   : > { %4942 = dma.done.wait (%p5676_p5), [#allocation15], 3072   ;;  %p5677_p8 = pmov %p5674_p0 }
  0xa2   : > { %v4975_v0 = vmov 0.0   ;;  %vm4976_vm0 = vmmov 0   ;;  %v4470_v1 = vld [vmem:[#allocation5 + $0x78] sm:$0xff]   ;;  %v4473_v4 = vld [vmem:[#allocation5 + $0x70] sm:$0xff]   ;;  %v4476_v7 = vld [vmem:[#allocation5 + $0x68] sm:$0xff]   ;;  %vm625_vm2 = vcmask 1040384   ;;  %v651_v43 = vlaneseq }
  0xa3   : > { %4944 = vsyncadd (%p5677_p8), [#allocation15], 4294964224  ;;  %4265 = vmatprep.subr.bf16.mxu1 %v4975_v0  ;;  %4281 = vmatprep.mubr.msk.bf16.mxu1 %vm4976_vm0, %v4975_v0  ;;  %v4471_v2 = vld [vmem:[#allocation5 + $0x38] sm:$0xff]   ;;  %v4474_v5 = vld [vmem:[#allocation5 + $0x30] sm:$0xff]   ;;  %vm626_vm1 = vsmask.f32 256 }
  0xa4   : > { %4009 = vmatprep.subr.bf16.mxu0 %v4470_v1  ;;  %v4472_v3 = vld [vmem:[#allocation5 + $0xb8] sm:$0xff]   ;;  %v4475_v6 = vld [vmem:[#allocation5 + $0xb0] sm:$0xff]   ;;  %v4477_v8 = vld [vmem:[#allocation5 + $0x28] sm:$0xff]   ;;  %vm630_vm4 = vsmask.f32 7424  ;;  %vm646_vm5 = vcmask 1046528  }
  0xa5   : > { %4010 = vmatpush3.bf16.msra.mxu0 %v4471_v2  ;;  %4266 = vmatpush3.bf16.msra.mxu1 %v4472_v3  ;;  %v4478_v9 = vld [vmem:[#allocation5 + $0xa8] sm:$0xff]   ;;  %v4479_v10 = vld [vmem:[#allocation5 + $0x60] sm:$0xff]   ;;  %v4482_v13 = vld [vmem:[#allocation5 + $0x58] sm:$0xff]   ;;  %v5300_v44 = vshrl.u32 %v651_v43, 7  ;;  %vm980_vm7 = vcmask 1041408   ;;  %vm1110_vm8 = vcmask 1042434  }
  0xa6   : > { %4011 = vmatprep.subr.bf16.mxu0 %v4473_v4  ;;  %4267 = vmatprep.subr.bf16.mxu1 %v4975_v0  ;;  %v4480_v11 = vld [vmem:[#allocation5 + $0x20] sm:$0xff]   ;;  %v4483_v14 = vld [vmem:[#allocation5 + $0x18] sm:$0xff]   ;;  %v4485_v16 = vld [vmem:[#allocation5 + $0x50] sm:$0xff]   ;;  %vm1112_vm9 = vcmask 1043459   ;;  %vm1114_vm10 = vcmask 1044484   ;;  %vm1116_vm11 = vcmask 1045509  }
  0xa7   : > { %v4481_v12 = vld [vmem:[#allocation5 + $0xa0] sm:$0xff]   ;;  %v4484_v15 = vld [vmem:[#allocation5 + $0x98] sm:$0xff]   ;;  %v4486_v17 = vld [vmem:[#allocation5 + $0x10] sm:$0xff]   ;;  %v5303_v46 = vsub.s32 0, %v5300_v44  ;;  %vm1118_vm12 = vcmask 1046534   ;;  %vm1120_vm13 = vcmask 1047559  }
  0xa8   : > { %v4487_v18 = vld [vmem:[#allocation5 + $0x90] sm:$0xff]   ;;  %v4488_v19 = vld [vmem:[#allocation5 + $0x48] sm:$0xff]   ;;  %v4491_v22 = vld [vmem:[#allocation5 + $0x40] sm:$0xff]   ;;  %vm1125_vm14 = vcmask 1044480   ;;  %vm1126_vm15 = vsmask.f32 4352 }
  0xa9   : > { %4012 = vmatpush3.bf16.msra.mxu0 %v4474_v5  ;;  %4268 = vmatpush3.bf16.msra.mxu1 %v4475_v6  ;;  %v4489_v20 = vld [vmem:[#allocation5 + $0x8] sm:$0xff]   ;;  %v4494_v23 = vld [vmem:[%s5253_s24] sm:$0xff]   ;;  %v4492_v24 = vld [vmem:[#allocation5] sm:$0xff]   ;;  %v5309_v6 = vand.u32 127, %v651_v43  ;;  %s3798_s29 = sshll.u32 %s5249_s9, 4  ;;  %s4008_s24 = sshll.u32 %s5073_s14, 8 }
  0xaa   : > { %4013 = vmatprep.subr.bf16.mxu0 %v4476_v7  ;;  %4269 = vmatprep.subr.bf16.mxu1 %v4975_v0  ;;  %v4490_v21 = vld [vmem:[#allocation5 + $0x88] sm:$0xff]   ;;  %v617_v25 = vshrl.u32 %v4494_v23, 16  ;;  %v620_v26 = vshll.u32 %v4494_v23, 16  ;;  %vm5286_vm3 = vmand %vm625_vm2, %vm626_vm1  ;;  %v4493_v28 = vld [vmem:[#allocation5 + $0x80] sm:$0xff]   ;;  %s558_s11 = scalar_lea.vmem [#allocation16], %s3798_s29  ;;  %s5581_s15 = scalar_lea.hbm %s5637_s13, %s4008_s24 }
  0xab   : > { %v5305_v48 = vld [vmem:[#allocation7] sm:$0x7]  ;;  %vm883_vm6 = vcmp.lt.s32.totalorder %v5309_v6, 8  ;;  %v4501_v23 = vld [vmem:[#allocation8 + $0x30] sm:$0xff]   ;;  %vm5365_vm1 = vmand %vm1125_vm14, %vm1126_vm15  ;;  %vm1368_vm2 = vcmp.lt.s32.totalorder %v5309_v6, 16  ;;  %s3636_s2 = sshll.u32 %s558_s11, 4  ;;  %s5576_s2 = int_to_ptr.vmem [resolvable:$true] %s3636_s2 }
  0xac   : > { %v619_v29 = vrot.slane %v617_v25, 7  ;;  %v654_v51 = vrot.slane %v5305_v48, %v5303_v46  ;;  %v4503_v25 = vld [vmem:[#allocation8 + $0xa0] sm:$0xff]   ;;  %s3623_s23 = scalar_lea.sflag [#allocation4], %s5249_s9  ;;  %s4883_s1 = scalar_lea.vmem %s5576_s2, 256 }
  0xad   : > { %4014 = vmatpush3.bf16.msra.mxu0 %v4477_v8  ;;  %4270 = vmatpush3.bf16.msra.mxu1 %v4478_v9  ;;  %p4884_p10 = scmp.ne.s32.totalorder %s5576_s2, %s4883_s1  ;;  %p5682_p11 = scmp.ne.s32.totalorder %s5663_s19, 0 }
  0xae   : > { %4015 = vmatprep.subr.bf16.mxu0 %v4479_v10  ;;  %4271 = vmatprep.subr.bf16.mxu1 %v4975_v0  ;;  %v622_v30 = vor.u32 %v620_v26, %v619_v29  ;;  %v629_v31 = vsel %vm5286_vm3, %v619_v29, 0  ;;  %v5313_v10 = vsel %vm883_vm6, 1.0, %v4975_v0  ;;  %v4504_v26 = vld [vmem:[#allocation8 + $0x28] sm:$0xff]   ;;  %v4506_v29 = vld [vmem:[#allocation8 + $0x98] sm:$0xff]   ;;  %vm1524_vm6 = vcmask 1042432   ;;  %s4979_s14 = smov [#allocation16]  }
  0xaf   : > { %v639_v32 = vshll.u32 %v629_v31, 16  ;;  %v648_v33 = vrot.slane %v629_v31, 1  ;;  %v4508_v31 = vld [vmem:[#allocation8 + $0x58] sm:$0xff]   ;;  %p4885_p1 = pnand %p4884_p10, %p5682_p11  ;;  %s4887_s18 = sshll.u32 %s4979_s14, 4  ;;  %s4888_s18 = int_to_ptr.vmem [resolvable:$false] %s4887_s18 }
  0xb0   : > { %v628_v34 = vsel %vm5286_vm3, 0, %v622_v30  ;;  %v4507_v30 = vld [vmem:[#allocation8 + $0x20] sm:$0xff]   ;;  %s4889_s30 = scalar_lea.vmem %s4888_s18, 512  ;;  %p4890_p7 = scmp.lt.s32.totalorder %s5576_s2, %s4888_s18 }
  0xb1   : > { %4016 = vmatpush3.bf16.msra.mxu0 %v4480_v11  ;;  %4272 = vmatpush3.bf16.msra.mxu1 %v4481_v12  ;;  %v632_v35 = vshrl.u32 %v628_v34, 16  ;;  %v634_v36 = vshll.u32 %v628_v34, 16  ;;  %v647_v37 = vrot.slane %v628_v34, 1  ;;  %v641_v39 = vrot.slane %v639_v32, 1  ;;  %v4509_v32 = vld [vmem:[#allocation8 + $0x90] sm:$0xff]   ;;  %p4886_p3 = pneg %p4885_p1  ;;  %p4891_p9 = scmp.lt.s32.totalorder %s4889_s30, %s4883_s1 }
  0xb2   : > { %4017 = vmatprep.subr.bf16.mxu0 %v4482_v13  ;;  %4273 = vmatprep.subr.bf16.mxu1 %v4975_v0 }
  0xb3   : > { %v636_v38 = vrot.slane %v634_v36, 1  ;;  %v649_v40 = vsel %vm646_vm5, %v647_v37, %v648_v33  ;;  %v4510_v33 = vld [vmem:[#allocation8 + $0x18] sm:$0xff]   ;;  %v4513_v36 = vld [vmem:[#allocation8 + $0x10] sm:$0xff]   ;;  %v4514_v37 = vld [vmem:[#allocation8 + $0x48] sm:$0xff]   ;;  %p4892_p6 = por %p4891_p9, %p4890_p7 }
  0xb5   : > { %4018 = vmatpush3.bf16.msra.mxu0 %v4483_v14  ;;  %4274 = vmatpush3.bf16.msra.mxu1 %v4484_v15  ;;  %v637_v41 = vor.u32 %v636_v38, %v632_v35  ;;  %v4512_v35 = vld [vmem:[#allocation8 + $0x88] sm:$0xff]   ;;  %v4515_v38 = vld [vmem:[#allocation8 + $0x80] sm:$0xff]   ;;  %p4893_p12 = pnand %p4892_p6, %p4886_p3 }
  0xb6   : > { %4019 = vmatprep.subr.bf16.mxu0 %v4485_v16  ;;  %4275 = vmatprep.subr.bf16.mxu1 %v4975_v0 }
  0xb7   : > { %v642_v42 = vsel %vm630_vm4, %v637_v41, %v641_v39  ;;  %v4516_v39 = vld [vmem:[#allocation8 + $0x8] sm:$0xff]   ;;  %v4518_v41 = vld [vmem:[#allocation8] sm:$0xff]  }
  0xb8   : > { %831 = vmatprep.mubr.bf16.mxu0 %v642_v42 }
  0xb9   : > { %4020 = vmatpush3.bf16.msra.mxu0 %v4486_v17  ;;  %4276 = vmatpush3.bf16.msra.mxu1 %v4487_v18  ;;  %v4495_v17 = vld [vmem:[#allocation8 + $0xb8] sm:$0xff]  }
  0xba   : > { %4021 = vmatprep.subr.bf16.mxu0 %v4488_v19  ;;  %4277 = vmatprep.subr.bf16.mxu1 %v4975_v0  ;;  %v4496_v18 = vld [vmem:[#allocation8 + $0x78] sm:$0xff]   ;;  %v4497_v19 = vld [vmem:[#allocation8 + $0xb0] sm:$0xff]  }
  0xbd   : > { %4022 = vmatpush3.bf16.msra.mxu0 %v4489_v20  ;;  %4278 = vmatpush3.bf16.msra.mxu1 %v4490_v21  ;;  %v4498_v20 = vld [vmem:[#allocation8 + $0x38] sm:$0xff]   ;;  %v4499_v21 = vld [vmem:[#allocation8 + $0x70] sm:$0xff]  }
  0xbe   : > { %4023 = vmatprep.subr.bf16.mxu0 %v4491_v22  ;;  %4279 = vmatprep.subr.bf16.mxu1 %v4975_v0  ;;  %v4500_v22 = vld [vmem:[#allocation8 + $0xa8] sm:$0xff]  }
  0xc1   : > { %4024 = vmatpush3.bf16.msra.mxu0 %v4492_v24  ;;  %4280 = vmatpush3.bf16.msra.mxu1 %v4493_v28  ;;  %v4502_v24 = vld [vmem:[#allocation8 + $0x68] sm:$0xff]   ;;  %v4505_v28 = vld [vmem:[#allocation8 + $0x60] sm:$0xff]  }
  0xc2   : > { %4285 = vmatprep.subr.bf16.mxu1 %v4975_v0  ;;  %4040 = vmatprep.subr.bf16.mxu0 %v4496_v18 }
  0xc4   : > { %4282 = vmatmul.mubr.bf16.vlgmr.msra.gmra.mxu1 %v649_v40  ;;  %832 = vmatmul.mubr.bf16.vlgmr.msra.gmra.mxu0 %v628_v34  ;;  %v4511_v34 = vld [vmem:[#allocation8 + $0x50] sm:$0xff]   ;;  %v4517_v40 = vld [vmem:[#allocation8 + $0x40] sm:$0xff]  }
  0xc5   : > { %4301 = vmatprep.mubr.msk.bf16.mxu1 %vm4976_vm0, %v4975_v0  ;;  %4286 = vmatpush3.bf16.msra.mxu1 %v4495_v17 }
  0xc6   : > { %4287 = vmatprep.subr.bf16.mxu1 %v4975_v0  ;;  %4041 = vmatpush3.bf16.msra.mxu0 %v4498_v20 }
  0xc7   : > { %4042 = vmatprep.subr.bf16.mxu0 %v4499_v21 }
  0xc9   : > { %4288 = vmatpush3.bf16.msra.mxu1 %v4497_v19 }
  0xca   : > { %4289 = vmatprep.subr.bf16.mxu1 %v4975_v0  ;;  %4043 = vmatpush3.bf16.msra.mxu0 %v4501_v23 }
  0xcb   : > { %4044 = vmatprep.subr.bf16.mxu0 %v4502_v24 }
  0xcd   : > { %4290 = vmatpush3.bf16.msra.mxu1 %v4500_v22 }
  0xce   : > { %4291 = vmatprep.subr.bf16.mxu1 %v4975_v0  ;;  %4045 = vmatpush3.bf16.msra.mxu0 %v4504_v26 }
  0xcf   : > { %4046 = vmatprep.subr.bf16.mxu0 %v4505_v28 }
  0xd1   : > { %4292 = vmatpush3.bf16.msra.mxu1 %v4503_v25 }
  0xd2   : > { %4293 = vmatprep.subr.bf16.mxu1 %v4975_v0  ;;  %4047 = vmatpush3.bf16.msra.mxu0 %v4507_v30 }
  0xd3   : > { %4048 = vmatprep.subr.bf16.mxu0 %v4508_v31 }
  0xd5   : > { %4294 = vmatpush3.bf16.msra.mxu1 %v4506_v29 }
  0xd6   : > { %4295 = vmatprep.subr.bf16.mxu1 %v4975_v0  ;;  %4049 = vmatpush3.bf16.msra.mxu0 %v4510_v33 }
  0xd7   : > { %4050 = vmatprep.subr.bf16.mxu0 %v4511_v34 }
  0xd9   : > { %4296 = vmatpush3.bf16.msra.mxu1 %v4509_v32 }
  0xda   : > { %4297 = vmatprep.subr.bf16.mxu1 %v4975_v0  ;;  %4051 = vmatpush3.bf16.msra.mxu0 %v4513_v36 }
  0xdb   : > { %4052 = vmatprep.subr.bf16.mxu0 %v4514_v37 }
  0xdd   : > { %4298 = vmatpush3.bf16.msra.mxu1 %v4512_v35 }
  0xde   : > { %4299 = vmatprep.subr.bf16.mxu1 %v4975_v0  ;;  %4053 = vmatpush3.bf16.msra.mxu0 %v4516_v39 }
  0xdf   : > { %4054 = vmatprep.subr.bf16.mxu0 %v4517_v40 }
  0xe1   : > { %4300 = vmatpush3.bf16.msra.mxu1 %v4515_v38 }
  0xe2   : > { %4305 = vmatprep.subr.bf16.mxu1 %v4975_v0  ;;  %4055 = vmatpush3.bf16.msra.mxu0 %v4518_v41 }
 0x184   : > { %v874_v45 = vpop.f32.mrf.mxu1  ;;  %v4025_v50 = vpop.f32.mrf.mxu0 }
 0x186   : > { %v4283_v47 = vpop.f32.mrf.mxu1  ;;  %v4026_v53 = vpop.f32.mrf.mxu0 }
 0x187   : > { %v4027_v54 = vadd.f32 %v4026_v53, %v4025_v50 }
 0x188   : > { %v877_v49 = vpop.f32.mrf.mxu1  ;;  %v4028_v55 = vpop.f32.mrf.mxu0 }
 0x189   : > { %v834_v56 = vadd.f32 %v4027_v54, %v654_v51 }
 0x18a   : > { %v4284_v52 = vpop.f32.mrf.mxu1  ;;  %v4029_v57 = vpop.f32.mrf.mxu0 }
 0x18b   : > { %v4030_v58 = vadd.f32 %v4029_v57, %v4028_v55  ;;  %v875_v59 = vadd.f32 %v874_v45, %v834_v56  ;;  %v5334_v56 = vsub.s32 1, %v5300_v44  ;;  %v5337_v57 = vsub.s32 2, %v5300_v44 }
 0x18d   : > { %v837_v60 = vadd.f32 %v4030_v58, %v654_v51  ;;  %886 = vadd.xlane.f32.xlu0 %v875_v59  ;;  %v4977_v58 = vmov 1983009808  }
 0x18f   : > { %v878_v61 = vadd.f32 %v877_v49, %v837_v60  ;;  %v924_v60 = vrot.slane %v5305_v48, %v5334_v56 }
 0x191   : > { %888 = vadd.xlane.f32.xlu0 %v878_v61 }
 0x216   : > { %v887_v62 = vpop.xlane.xlu0 %886 }
 0x21a   : > { %v889_v63 = vpop.xlane.xlu0 %888 }
 0x21b   : > { %v890_v1 = vadd.f32 %v889_v63, %v887_v62  ;;  %v930_v62 = vrot.slane %v5305_v48, %v5337_v57 }
 0x21d   : > { %v891_v2 = vrot.slane %v890_v1, 4 }
 0x21f   : > { %v892_v3 = vadd.f32 %v891_v2, %v890_v1 }
 0x221   : > { %v893_v4 = vrot.slane %v892_v3, 2 }
 0x223   : > { %v894_v5 = vadd.f32 %v893_v4, %v892_v3 }
 0x225   : > { %v895_v7 = vrot.slane %v894_v5, 1 }
 0x227   : > { %v896_v8 = vadd.f32 %v895_v7, %v894_v5 }
 0x229   : > { %v898_v9 = vmul.f32 0.0078125, %v896_v8 }
 0x22b   : > { %v899_v11 = vsub.f32 %v875_v59, %v898_v9  ;;  %v900_v12 = vsub.f32 %v878_v61, %v898_v9  ;;  %v940_v59 = vunpack.c.l.s4 %v4977_v58 }
 0x22d   : > { %v5316_v13 = vmul.f32 %v5313_v10, %v899_v11  ;;  %v5321_v15 = vmul.f32 %v5313_v10, %v900_v12  ;;  %v941_v63 = vunpack.c.0.s8 %v940_v59 }
 0x22f   : > { %v903_v14 = vmul.f32 %v5316_v13, %v5316_v13  ;;  %v904_v16 = vmul.f32 %v5321_v15, %v5321_v15  ;;  %v5346_v5 = vsub.s32 %v941_v63, %v5300_v44 }
 0x231   : > { %905 = vadd.xlane.f32.xlu1 %v903_v14 }
 0x235   : > { %907 = vadd.xlane.f32.xlu1 %v904_v16 }
 0x2ba   : > { %v906_v42 = vpop.xlane.xlu1 %905 }
 0x2be   : > { %v908_v43 = vpop.xlane.xlu1 %907 }
 0x2bf   : > { %v909_v45 = vadd.f32 %v908_v43, %v906_v42 }
 0x2c1   : > { %v910_v47 = vrot.slane %v909_v45, 4 }
 0x2c3   : > { %v911_v49 = vadd.f32 %v910_v47, %v909_v45 }
 0x2c5   : > { %v912_v50 = vrot.slane %v911_v49, 2 }
 0x2c7   : > { %v913_v51 = vadd.f32 %v912_v50, %v911_v49 }
 0x2c9   : > { %v914_v52 = vrot.slane %v913_v51, 1 }
 0x2cb   : > { %v915_v53 = vadd.f32 %v914_v52, %v913_v51 }
 0x2cd   : > { %v916_v54 = vmul.f32 0.0078125, %v915_v53 }
 0x2cf   : > { %v917_v55 = vadd.f32 1e-05, %v916_v54 }
 0x2d1   : > { %4663 = vrsqrt.f32 %v917_v55 }
 0x2de   : > { %v4664_v61 = vpop.eup %4663 }
 0x2df   : > { %v919_v1 = vmul.f32 %v4664_v61, %v5316_v13  ;;  %v920_v2 = vmul.f32 %v4664_v61, %v5321_v15 }
 0x2e1   : > { %v925_v3 = vmul.f32 %v924_v60, %v919_v1  ;;  %v926_v4 = vmul.f32 %v924_v60, %v920_v2 }
 0x2e3   : > { %v931_v7 = vadd.f32 %v930_v62, %v925_v3  ;;  %v932_v8 = vadd.f32 %v930_v62, %v926_v4 }
 0x2e5   : > { %v933_v9 = vmax.f32 %v931_v7, 0.0  ;;  %v934_v11 = vmax.f32 %v932_v8, 0.0 }
 0x2e7   : > { %v938_v12 = vcombine.high %v933_v9, %v933_v9  ;;  %v945_v14 = vrot.slane %v933_v9, %v5346_v5  ;;  %v962_v48 = vrot.slane %v934_v11, %v5346_v5  ;;  %v955_v16 = vcombine.high %v934_v11, %v934_v11 }
 0x2e8   : > { %v5350_v17 = vpack.c.bf16 %v934_v11, %v933_v9 }
 0x2e9   : > { %v952_v13 = vrot.slane %v938_v12, %v5346_v5  ;;  %v953_v15 = vcombine.high %v945_v14, %v945_v14  ;;  %v981_v18 = vsel %vm980_vm7, %v945_v14, -inf  ;;  %v969_v19 = vrot.slane %v955_v16, %v5346_v5 }
 0x2ea   : > { %v982_v20 = vrot.slane %v981_v18, 4  ;;  %v970_v21 = vcombine.high %v962_v48, %v962_v48  ;;  %v1009_v22 = vsel %vm980_vm7, %v962_v48, -inf }
 0x2eb   : > { %v988_v23 = vsel %vm980_vm7, %v953_v15, -inf  ;;  %v954_v24 = vcombine.high %v952_v13, %v952_v13  ;;  %v971_v25 = vcombine.high %v969_v19, %v969_v19  ;;  %v995_v26 = vsel %vm980_vm7, %v952_v13, -inf }
 0x2ec   : > { %v983_v28 = vmax.f32 %v981_v18, %v982_v20  ;;  %v989_v29 = vrot.slane %v988_v23, 4  ;;  %v996_v30 = vrot.slane %v995_v26, 4  ;;  %v1010_v31 = vrot.slane %v1009_v22, 4 }
 0x2ed   : > { %v1002_v32 = vsel %vm980_vm7, %v954_v24, -inf  ;;  %v1016_v33 = vsel %vm980_vm7, %v970_v21, -inf  ;;  %v1023_v34 = vsel %vm980_vm7, %v969_v19, -inf  ;;  %v1030_v35 = vsel %vm980_vm7, %v971_v25, -inf }
 0x2ee   : > { %v984_v36 = vrot.slane %v983_v28, 2  ;;  %v990_v37 = vmax.f32 %v988_v23, %v989_v29  ;;  %v997_v38 = vmax.f32 %v995_v26, %v996_v30  ;;  %v1003_v39 = vrot.slane %v1002_v32, 4 }
 0x2ef   : > { %v1011_v40 = vmax.f32 %v1009_v22, %v1010_v31  ;;  %v1017_v41 = vrot.slane %v1016_v33, 4  ;;  %v1024_v42 = vrot.slane %v1023_v34, 4  ;;  %v1031_v43 = vrot.slane %v1030_v35, 4 }
 0x2f0   : > { %v985_v45 = vmax.f32 %v983_v28, %v984_v36  ;;  %v991_v47 = vrot.slane %v990_v37, 2  ;;  %v998_v49 = vrot.slane %v997_v38, 2  ;;  %v1004_v50 = vmax.f32 %v1002_v32, %v1003_v39 }
 0x2f1   : > { %v1012_v51 = vrot.slane %v1011_v40, 2  ;;  %v1018_v52 = vmax.f32 %v1016_v33, %v1017_v41  ;;  %v1025_v53 = vmax.f32 %v1023_v34, %v1024_v42  ;;  %v1032_v54 = vmax.f32 %v1030_v35, %v1031_v43 }
 0x2f2   : > { %v986_v55 = vrot.slane %v985_v45, 1  ;;  %v992_v58 = vmax.f32 %v990_v37, %v991_v47  ;;  %v999_v59 = vmax.f32 %v997_v38, %v998_v49  ;;  %v1005_v60 = vrot.slane %v1004_v50, 2 }
 0x2f3   : > { %v1013_v61 = vmax.f32 %v1011_v40, %v1012_v51  ;;  %v1019_v62 = vrot.slane %v1018_v52, 2  ;;  %v1026_v63 = vrot.slane %v1025_v53, 2  ;;  %v1033_v1 = vrot.slane %v1032_v54, 2  ;;  %v4580_v51 = vld [vmem:[#allocation11 + $0x128] sm:$0xff]  }
 0x2f4   : > { %v987_v2 = vmax.f32 %v985_v45, %v986_v55  ;;  %v993_v3 = vrot.slane %v992_v58, 1  ;;  %v1000_v4 = vrot.slane %v999_v59, 1  ;;  %v1006_v7 = vmax.f32 %v1004_v50, %v1005_v60 }
 0x2f5   : > { %v1014_v8 = vrot.slane %v1013_v61, 1  ;;  %v1020_v9 = vmax.f32 %v1018_v52, %v1019_v62  ;;  %v1027_v11 = vmax.f32 %v1025_v53, %v1026_v63  ;;  %v1034_v12 = vmax.f32 %v1032_v54, %v1033_v1  ;;  %v5378_v63 = vld [vmem:[%s5628_s4] sm:$0x7] }
 0x2f6   : > { %v994_v14 = vmax.f32 %v992_v58, %v993_v3  ;;  %v1001_v48 = vmax.f32 %v999_v59, %v1000_v4  ;;  %v1007_v16 = vrot.slane %v1006_v7, 1  ;;  %v1037_v13 = vpack.c.bf16 %v987_v2, %v987_v2 }
 0x2f7   : > { %v1015_v15 = vmax.f32 %v1013_v61, %v1014_v8  ;;  %v1021_v18 = vrot.slane %v1020_v9, 1  ;;  %v1028_v19 = vrot.slane %v1027_v11, 1  ;;  %v1035_v20 = vrot.slane %v1034_v12, 1 }
 0x2f8   : > { %v1008_v21 = vmax.f32 %v1006_v7, %v1007_v16  ;;  %v1038_v22 = vpack.c.bf16 %v994_v14, %v994_v14  ;;  %v1039_v23 = vpack.c.bf16 %v1001_v48, %v1001_v48  ;;  %v1102_v30 = vunpack.c.l.b16 %v1037_v13 }
 0x2f9   : > { %v1022_v24 = vmax.f32 %v1020_v9, %v1021_v18  ;;  %v1029_v25 = vmax.f32 %v1027_v11, %v1028_v19  ;;  %v1036_v26 = vmax.f32 %v1034_v12, %v1035_v20  ;;  %v1041_v28 = vpack.c.bf16 %v1015_v15, %v1015_v15 }
 0x2fa   : > { %v1040_v29 = vpack.c.bf16 %v1008_v21, %v1008_v21  ;;  %v1103_v31 = vunpack.c.l.b16 %v1038_v22  ;;  %v1104_v32 = vunpack.c.l.b16 %v1039_v23  ;;  %v1143_v4 = vrot.slane %v5378_v63, %v5303_v46 }
 0x2fb   : > { %v1042_v33 = vpack.c.bf16 %v1022_v24, %v1022_v24  ;;  %v1043_v34 = vpack.c.bf16 %v1029_v25, %v1029_v25  ;;  %v1044_v35 = vpack.c.bf16 %v1036_v26, %v1036_v26  ;;  %v1106_v38 = vunpack.c.l.b16 %v1041_v28  ;;  %v4519_v26 = vld [vmem:[#allocation10 + $0xb8] sm:$0xff]  }
 0x2fc   : > { %v1105_v36 = vunpack.c.l.b16 %v1040_v29  ;;  %v1111_v37 = vsel %vm1110_vm8, %v1103_v31, %v1102_v30  ;;  %v5384_v22 = vsel %vm1368_vm2, 1.0, %v4975_v0  ;;  %v4520_v28 = vld [vmem:[#allocation10 + $0x78] sm:$0xff]   ;;  %v4523_v30 = vld [vmem:[#allocation10 + $0x70] sm:$0xff]  }
 0x2fd   : > { %v1113_v39 = vsel %vm1112_vm9, %v1104_v32, %v1111_v37  ;;  %v1107_v40 = vunpack.c.l.b16 %v1042_v33  ;;  %v1108_v42 = vunpack.c.l.b16 %v1043_v34  ;;  %v1109_v45 = vunpack.c.l.b16 %v1044_v35  ;;  %v4522_v29 = vld [vmem:[#allocation10 + $0x38] sm:$0xff]   ;;  %4071 = vmatprep.subr.bf16.mxu0 %v4520_v28  ;;  %v4521_v31 = vld [vmem:[#allocation10 + $0xb0] sm:$0xff]   ;;  %v4526_v33 = vld [vmem:[#allocation10 + $0x68] sm:$0xff]  }
 0x2fe   : > { %v1115_v41 = vsel %vm1114_vm10, %v1105_v36, %v1113_v39  ;;  %v4525_v32 = vld [vmem:[#allocation10 + $0x30] sm:$0xff]   ;;  %v4524_v34 = vld [vmem:[#allocation10 + $0xa8] sm:$0xff]   ;;  %v4529_v36 = vld [vmem:[#allocation10 + $0x60] sm:$0xff]  }
 0x2ff   : > { %v1117_v43 = vsel %vm1116_vm11, %v1106_v38, %v1115_v41  ;;  %v4528_v35 = vld [vmem:[#allocation10 + $0x28] sm:$0xff]   ;;  %v4527_v37 = vld [vmem:[#allocation10 + $0xa0] sm:$0xff]   ;;  %v4532_v39 = vld [vmem:[#allocation10 + $0x58] sm:$0xff]  }
 0x300   : > { %v1119_v47 = vsel %vm1118_vm12, %v1107_v40, %v1117_v43  ;;  %v4531_v38 = vld [vmem:[#allocation10 + $0x20] sm:$0xff]   ;;  %v4530_v40 = vld [vmem:[#allocation10 + $0x98] sm:$0xff]   ;;  %v4533_v43 = vld [vmem:[#allocation10 + $0x90] sm:$0xff]  }
 0x301   : > { %v1121_v49 = vsel %vm1120_vm13, %v1108_v42, %v1119_v47  ;;  %v4534_v41 = vld [vmem:[#allocation10 + $0x18] sm:$0xff]   ;;  %v4535_v42 = vld [vmem:[#allocation10 + $0x50] sm:$0xff]   ;;  %v4538_v47 = vld [vmem:[#allocation10 + $0x48] sm:$0xff]  }
 0x302   : > { %v1122_v50 = vpack.c.b16 %v1109_v45, %v1121_v49  ;;  %v4537_v45 = vld [vmem:[#allocation10 + $0x10] sm:$0xff]   ;;  %v4536_v49 = vld [vmem:[#allocation10 + $0x88] sm:$0xff]  }
 0x304   : > { %v1124_v52 = vsel %vm5286_vm3, 0, %v1122_v50  ;;  %v4540_v50 = vld [vmem:[#allocation10 + $0x8] sm:$0xff]  }
 0x305   : > { %v1128_v53 = vsel %vm5365_vm1, %v1124_v52, 0  ;;  %v4539_v52 = vld [vmem:[#allocation10 + $0x80] sm:$0xff]  }
 0x306   : > { %v1138_v54 = vrot.slane %v1128_v53, 1  ;;  %v1132_v55 = vshll.u32 %v1128_v53, 16  ;;  %v1130_v58 = vshrl.u32 %v1128_v53, 16 }
 0x308   : > { %4302 = vmatmul.mubr.bf16.vlgmr.msra.gmra.mxu1 %v1138_v54  ;;  %v1134_v59 = vrot.slane %v1132_v55, 1  ;;  %v4542_v54 = vld [vmem:[#allocation10] sm:$0xff]  }
 0x309   : > { %4321 = vmatprep.mubr.msk.bf16.mxu1 %vm4976_vm0, %v4975_v0  ;;  %4306 = vmatpush3.bf16.msra.mxu1 %v4519_v26 }
 0x30a   : > { %v1135_v60 = vor.u32 %v1134_v59, %v1130_v58  ;;  %4307 = vmatprep.subr.bf16.mxu1 %v4975_v0 }
 0x30c   : > { %1320 = vmatprep.mubr.bf16.mxu0 %v1135_v60 }
 0x30d   : > { %1321 = vmatmul.mubr.bf16.vlgmr.msra.gmra.mxu0 %v1128_v53  ;;  %4308 = vmatpush3.bf16.msra.mxu1 %v4521_v31  ;;  %v4541_v53 = vld [vmem:[#allocation10 + $0x40] sm:$0xff]  }
 0x30e   : > { %4072 = vmatpush3.bf16.msra.mxu0 %v4522_v29  ;;  %4309 = vmatprep.subr.bf16.mxu1 %v4975_v0 }
 0x30f   : > { %4073 = vmatprep.subr.bf16.mxu0 %v4523_v30 }
 0x311   : > { %4310 = vmatpush3.bf16.msra.mxu1 %v4524_v34 }
 0x312   : > { %4074 = vmatpush3.bf16.msra.mxu0 %v4525_v32  ;;  %4311 = vmatprep.subr.bf16.mxu1 %v4975_v0 }
 0x313   : > { %4075 = vmatprep.subr.bf16.mxu0 %v4526_v33 }
 0x315   : > { %4312 = vmatpush3.bf16.msra.mxu1 %v4527_v37 }
 0x316   : > { %4076 = vmatpush3.bf16.msra.mxu0 %v4528_v35  ;;  %4313 = vmatprep.subr.bf16.mxu1 %v4975_v0 }
 0x317   : > { %4077 = vmatprep.subr.bf16.mxu0 %v4529_v36 }
 0x319   : > { %4314 = vmatpush3.bf16.msra.mxu1 %v4530_v40 }
 0x31a   : > { %4078 = vmatpush3.bf16.msra.mxu0 %v4531_v38  ;;  %4315 = vmatprep.subr.bf16.mxu1 %v4975_v0 }
 0x31b   : > { %4079 = vmatprep.subr.bf16.mxu0 %v4532_v39 }
 0x31d   : > { %4316 = vmatpush3.bf16.msra.mxu1 %v4533_v43 }
 0x31e   : > { %4080 = vmatpush3.bf16.msra.mxu0 %v4534_v41  ;;  %4317 = vmatprep.subr.bf16.mxu1 %v4975_v0 }
 0x31f   : > { %4081 = vmatprep.subr.bf16.mxu0 %v4535_v42 }
 0x321   : > { %4318 = vmatpush3.bf16.msra.mxu1 %v4536_v49 }
 0x322   : > { %4082 = vmatpush3.bf16.msra.mxu0 %v4537_v45  ;;  %4319 = vmatprep.subr.bf16.mxu1 %v4975_v0 }
 0x323   : > { %4083 = vmatprep.subr.bf16.mxu0 %v4538_v47 }
 0x325   : > { %4320 = vmatpush3.bf16.msra.mxu1 %v4539_v52 }
 0x326   : > { %4084 = vmatpush3.bf16.msra.mxu0 %v4540_v50 }
 0x327   : > { %4085 = vmatprep.subr.bf16.mxu0 %v4541_v53 }
 0x32a   : > { %4086 = vmatpush3.bf16.msra.mxu0 %v4542_v54 }
 0x3c8   : > { %v1362_v61 = vpop.f32.mrf.mxu1 }
 0x3ca   : > { %v4303_v62 = vpop.f32.mrf.mxu1 }
 0x3cc   : > { %v1365_v1 = vpop.f32.mrf.mxu1 }
 0x3cd   : > { %v4056_v2 = vpop.f32.mrf.mxu0 }
 0x3ce   : > { %v4304_v3 = vpop.f32.mrf.mxu1 }
 0x3cf   : > { %v4057_v7 = vpop.f32.mrf.mxu0 }
 0x3d0   : > { %v4058_v8 = vadd.f32 %v4057_v7, %v4056_v2 }
 0x3d1   : > { %v4059_v9 = vpop.f32.mrf.mxu0 }
 0x3d2   : > { %v1323_v11 = vadd.f32 %v4058_v8, %v1143_v4  ;;  %v1398_v4 = vrot.slane %v5378_v63, %v5334_v56  ;;  %v1403_v8 = vrot.slane %v5378_v63, %v5337_v57 }
 0x3d3   : > { %v4060_v12 = vpop.f32.mrf.mxu0 }
 0x3d4   : > { %v1363_v14 = vadd.f32 %v1362_v61, %v1323_v11 }
 0x3d6   : > { %1371 = vadd.xlane.f32.xlu0 %v1363_v14 }
 0x45f   : > { %v1372_v48 = vpop.xlane.xlu0 %1371 }
 0x460   : > { %v1373_v16 = vrot.slane %v1372_v48, 4 }
 0x462   : > { %v1374_v13 = vadd.f32 %v1373_v16, %v1372_v48 }
 0x464   : > { %v1375_v15 = vrot.slane %v1374_v13, 2 }
 0x466   : > { %v1376_v18 = vadd.f32 %v1375_v15, %v1374_v13 }
 0x468   : > { %v1377_v19 = vrot.slane %v1376_v18, 1 }
 0x46a   : > { %v1378_v20 = vadd.f32 %v1377_v19, %v1376_v18 }
 0x46c   : > { %v1379_v21 = vmul.f32 0.0078125, %v1378_v20 }
 0x46e   : > { %v1380_v23 = vsub.f32 %v1363_v14, %v1379_v21 }
 0x470   : > { %v5387_v24 = vmul.f32 %v5384_v22, %v1380_v23 }
 0x472   : > { %v1382_v25 = vmul.f32 %v5387_v24, %v5387_v24 }
 0x474   : > { %1383 = vadd.xlane.f32.xlu1 %v1382_v25 }
 0x4fd   : > { %v1384_v55 = vpop.xlane.xlu1 %1383 }
 0x4fe   : > { %v1385_v58 = vrot.slane %v1384_v55, 4 }
 0x500   : > { %v1386_v59 = vadd.f32 %v1385_v58, %v1384_v55 }
 0x502   : > { %v1387_v60 = vrot.slane %v1386_v59, 2 }
 0x504   : > { %v1388_v61 = vadd.f32 %v1387_v60, %v1386_v59 }
 0x506   : > { %v1389_v62 = vrot.slane %v1388_v61, 1 }
 0x508   : > { %v1390_v1 = vadd.f32 %v1389_v62, %v1388_v61 }
 0x50a   : > { %v1391_v2 = vmul.f32 0.0078125, %v1390_v1 }
 0x50c   : > { %v1392_v3 = vadd.f32 1e-05, %v1391_v2 }
 0x50e   : > { %4665 = vrsqrt.f32 %v1392_v3 }
 0x51b   : > { %v4666_v7 = vpop.eup %4665 }
 0x51c   : > { %v1394_v9 = vmul.f32 %v4666_v7, %v5387_v24 }
 0x51e   : > { %v1399_v11 = vmul.f32 %v1398_v4, %v1394_v9 }
 0x520   : > { %v1404_v12 = vadd.f32 %v1403_v8, %v1399_v11 }
 0x522   : > { %v1405_v14 = vmax.f32 %v1404_v12, 0.0 }
 0x524   : > { %v1408_v48 = vcombine.high %v1405_v14, %v1405_v14  ;;  %v1415_v16 = vrot.slane %v1405_v14, %v5346_v5  ;;  %v1406_v35 = vpack.c.bf16 %v1405_v14, %v1405_v14 }
 0x526   : > { %v1422_v13 = vrot.slane %v1408_v48, %v5346_v5  ;;  %v1423_v15 = vcombine.high %v1415_v16, %v1415_v16  ;;  %v1429_v18 = vsel %vm980_vm7, %v1415_v16, -inf  ;;  %v2031_v45 = vshrl.u32 %v1406_v35, 16 }
 0x527   : > { %v1430_v19 = vrot.slane %v1429_v18, 4  ;;  %v2034_v3 = vshll.u32 %v1406_v35, 16 }
 0x528   : > { %v1424_v20 = vcombine.high %v1422_v13, %v1422_v13  ;;  %v1436_v21 = vsel %vm980_vm7, %v1423_v15, -inf  ;;  %v1443_v23 = vsel %vm980_vm7, %v1422_v13, -inf  ;;  %v2033_v58 = vrot.slane %v2031_v45, 7 }
 0x529   : > { %v1431_v63 = vmax.f32 %v1429_v18, %v1430_v19  ;;  %v1437_v25 = vrot.slane %v1436_v21, 4  ;;  %v1444_v24 = vrot.slane %v1443_v23, 4 }
 0x52a   : > { %v1450_v26 = vsel %vm980_vm7, %v1424_v20, -inf  ;;  %vm1525_vm7 = vsmask.f32 2304  ;;  %v2036_v8 = vor.u32 %v2034_v3, %v2033_v58  ;;  %v4549_v58 = vld [vmem:[#allocation11 + $0x70] sm:$0xff]   ;;  %v4557_v3 = vld [vmem:[#allocation11 + $0x60] sm:$0xff]  }
 0x52b   : > { %v1432_v28 = vrot.slane %v1431_v63, 2  ;;  %v1438_v29 = vmax.f32 %v1436_v21, %v1437_v25  ;;  %v1445_v30 = vmax.f32 %v1443_v23, %v1444_v24  ;;  %v1451_v31 = vrot.slane %v1450_v26, 4  ;;  %vm1526_vm11 = vmand %vm1524_vm6, %vm1525_vm7  ;;  %v5424_v23 = vld [vmem:[%s5630_s6] sm:$0x7] }
 0x52c   : > { %v2038_v14 = vsel %vm5286_vm3, 0, %v2036_v8  ;;  %v4559_v8 = vld [vmem:[#allocation11 + $0x20] sm:$0xff]  }
 0x52d   : > { %v1433_v32 = vmax.f32 %v1431_v63, %v1432_v28  ;;  %v1439_v5 = vrot.slane %v1438_v29, 2  ;;  %v1446_v33 = vrot.slane %v1445_v30, 2  ;;  %v1452_v34 = vmax.f32 %v1450_v26, %v1451_v31 }
 0x52e   : > { %v5418_v13 = vsel %vm5365_vm1, %v2038_v14, 0  ;;  %v1542_v26 = vrot.slane %v5424_v23, %v5303_v46  ;;  %v4563_v14 = vld [vmem:[#allocation11 + $0x18] sm:$0xff]  }
 0x52f   : > { %v1434_v36 = vrot.slane %v1433_v32, 1  ;;  %v1440_v37 = vmax.f32 %v1438_v29, %v1439_v5  ;;  %v1447_v38 = vmax.f32 %v1445_v30, %v1446_v33  ;;  %v1453_v39 = vrot.slane %v1452_v34, 2 }
 0x531   : > { %v1435_v40 = vmax.f32 %v1433_v32, %v1434_v36  ;;  %v1441_v41 = vrot.slane %v1440_v37, 1  ;;  %v1448_v42 = vrot.slane %v1447_v38, 1  ;;  %v1454_v43 = vmax.f32 %v1452_v34, %v1453_v39 }
 0x533   : > { %v1442_v47 = vmax.f32 %v1440_v37, %v1441_v41  ;;  %v1449_v49 = vmax.f32 %v1447_v38, %v1448_v42  ;;  %v1455_v50 = vrot.slane %v1454_v43, 1  ;;  %v1457_v52 = vpack.c.bf16 %v1435_v40, %v1435_v40 }
 0x535   : > { %v1456_v53 = vmax.f32 %v1454_v43, %v1455_v50  ;;  %v1458_v54 = vpack.c.bf16 %v1442_v47, %v1442_v47  ;;  %v1459_v55 = vpack.c.bf16 %v1449_v49, %v1449_v49  ;;  %v1514_v60 = vunpack.c.l.b16 %v1457_v52  ;;  %v4543_v50 = vld [vmem:[#allocation11 + $0xf8] sm:$0xff]  }
 0x536   : > { %v4544_v52 = vld [vmem:[#allocation11 + $0xb8] sm:$0xff]   ;;  %4124 = vmatprep.subr.bf16.mxu1 %v4543_v50 }
 0x537   : > { %v1460_v59 = vpack.c.bf16 %v1456_v53, %v1456_v53  ;;  %v1515_v61 = vunpack.c.l.b16 %v1458_v54  ;;  %v1516_v62 = vunpack.c.l.b16 %v1459_v55  ;;  %v4545_v53 = vld [vmem:[#allocation11 + $0x78] sm:$0xff]   ;;  %v4546_v54 = vld [vmem:[#allocation11 + $0xf0] sm:$0xff]  }
 0x538   : > { %v4547_v55 = vld [vmem:[#allocation11 + $0x38] sm:$0xff]   ;;  %4102 = vmatprep.subr.bf16.mxu0 %v4545_v53 }
 0x539   : > { %v1517_v1 = vunpack.c.l.b16 %v1460_v59  ;;  %v1518_v2 = vsel %vm1110_vm8, %v1515_v61, %v1514_v60  ;;  %vm1767_vm8 = vcmask 1043456   ;;  %v4548_v59 = vld [vmem:[#allocation11 + $0xb0] sm:$0xff]   ;;  %v4553_v61 = vld [vmem:[#allocation11 + $0x68] sm:$0xff]  }
 0x53a   : > { %v1519_v4 = vsel %vm1112_vm9, %v1516_v62, %v1518_v2  ;;  %v4551_v60 = vld [vmem:[#allocation11 + $0x30] sm:$0xff]   ;;  %v4552_v62 = vld [vmem:[#allocation11 + $0xa8] sm:$0xff]  }
 0x53b   : > { %v1520_v7 = vsel %vm1114_vm10, %v1517_v1, %v1519_v4  ;;  %v4554_v1 = vld [vmem:[#allocation11 + $0xe0] sm:$0xff]   ;;  %v4555_v2 = vld [vmem:[#allocation11 + $0x28] sm:$0xff]  }
 0x53c   : > { %v1521_v9 = vpack.c.b16 %v1520_v7, %v1520_v7  ;;  %v4556_v4 = vld [vmem:[#allocation11 + $0xa0] sm:$0xff]   ;;  %v4558_v7 = vld [vmem:[#allocation11 + $0xd8] sm:$0xff]  }
 0x53e   : > { %v1523_v11 = vsel %vm5286_vm3, 0, %v1521_v9  ;;  %v4561_v9 = vld [vmem:[#allocation11 + $0x58] sm:$0xff]  }
 0x53f   : > { %v1527_v12 = vsel %vm1526_vm11, %v1523_v11, 0  ;;  %v4560_v11 = vld [vmem:[#allocation11 + $0x98] sm:$0xff]  }
 0x540   : > { %v1537_v48 = vrot.slane %v1527_v12, 1  ;;  %v1531_v16 = vshll.u32 %v1527_v12, 16  ;;  %v1529_v15 = vshrl.u32 %v1527_v12, 16 }
 0x542   : > { %4322 = vmatmul.mubr.bf16.vlgmr.msra.gmra.mxu1 %v1537_v48  ;;  %v1533_v18 = vrot.slane %v1531_v16, 1  ;;  %v4565_v48 = vld [vmem:[#allocation11 + $0x50] sm:$0xff]  }
 0x543   : > { %2415 = vmatprep.mubr.bf16.mxu1 %v5418_v13  ;;  %4125 = vmatpush3.bf16.msra.mxu1 %v4544_v52  ;;  %v4564_v16 = vld [vmem:[#allocation11 + $0x90] sm:$0xff]  }
 0x544   : > { %v1534_v19 = vor.u32 %v1533_v18, %v1529_v15  ;;  %4126 = vmatprep.subr.bf16.mxu1 %v4546_v54  ;;  %v4566_v15 = vld [vmem:[#allocation11 + $0xc8] sm:$0xff]   ;;  %v4567_v18 = vld [vmem:[#allocation11 + $0x10] sm:$0xff]  }
 0x546   : > { %1719 = vmatprep.mubr.bf16.mxu0 %v1534_v19  ;;  %v4569_v19 = vld [vmem:[#allocation11 + $0x48] sm:$0xff]  }
 0x547   : > { %1720 = vmatmul.mubr.bf16.vlgmr.msra.gmra.mxu0 %v1527_v12  ;;  %4127 = vmatpush3.bf16.msra.mxu1 %v4548_v59  ;;  %v4562_v12 = vld [vmem:[#allocation11 + $0xd0] sm:$0xff]  }
 0x548   : > { %4103 = vmatpush3.bf16.msra.mxu0 %v4547_v55 }
 0x549   : > { %4104 = vmatprep.subr.bf16.mxu0 %v4549_v58 }
 0x54c   : > { %4105 = vmatpush3.bf16.msra.mxu0 %v4551_v60 }
 0x54d   : > { %4106 = vmatprep.subr.bf16.mxu0 %v4553_v61 }
 0x550   : > { %4107 = vmatpush3.bf16.msra.mxu0 %v4555_v2 }
 0x551   : > { %4108 = vmatprep.subr.bf16.mxu0 %v4557_v3 }
 0x554   : > { %4109 = vmatpush3.bf16.msra.mxu0 %v4559_v8 }
 0x555   : > { %4110 = vmatprep.subr.bf16.mxu0 %v4561_v9 }
 0x558   : > { %4111 = vmatpush3.bf16.msra.mxu0 %v4563_v14 }
 0x559   : > { %4112 = vmatprep.subr.bf16.mxu0 %v4565_v48 }
 0x55c   : > { %4113 = vmatpush3.bf16.msra.mxu0 %v4567_v18 }
 0x55d   : > { %4114 = vmatprep.subr.bf16.mxu0 %v4569_v19 }
 0x602   : > { %v1761_v20 = vpop.f32.mrf.mxu1 }
 0x604   : > { %v4323_v21 = vpop.f32.mrf.mxu1 }
 0x605   : > { %v4570_v21 = vld [vmem:[#allocation11 + $0xc0] sm:$0xff]  }
 0x606   : > { %v1764_v63 = vpop.f32.mrf.mxu1 }
 0x607   : > { %v4087_v25 = vpop.f32.mrf.mxu0  ;;  %v4571_v63 = vld [vmem:[#allocation11 + $0x8] sm:$0xff]  }
 0x608   : > { %v4324_v24 = vpop.f32.mrf.mxu1  ;;  %4115 = vmatpush3.bf16.msra.mxu0 %v4571_v63 }
 0x609   : > { %v4088_v28 = vpop.f32.mrf.mxu0  ;;  %v4572_v24 = vld [vmem:[#allocation11 + $0x80] sm:$0xff]  }
 0x60a   : > { %v4089_v29 = vadd.f32 %v4088_v28, %v4087_v25  ;;  %v4573_v25 = vld [vmem:[#allocation11 + $0x40] sm:$0xff]   ;;  %v4575_v28 = vld [vmem:[#allocation11 + $0x178] sm:$0xff]  }
 0x60b   : > { %v4090_v30 = vpop.f32.mrf.mxu0  ;;  %4116 = vmatprep.subr.bf16.mxu0 %v4573_v25 }
 0x60c   : > { %v1722_v31 = vadd.f32 %v4089_v29, %v1542_v26  ;;  %v4574_v26 = vld [vmem:[#allocation11] sm:$0xff]  }
 0x60d   : > { %v4091_v32 = vpop.f32.mrf.mxu0  ;;  %4117 = vmatpush3.bf16.msra.mxu0 %v4574_v26 }
 0x60e   : > { %v1762_v5 = vadd.f32 %v1761_v20, %v1722_v31  ;;  %v4568_v20 = vld [vmem:[#allocation11 + $0x88] sm:$0xff]   ;;  %4146 = vmatprep.subr.bf16.mxu0 %v4575_v28 }
 0x610   : > { %v1768_v33 = vsel %vm1767_vm8, %v1762_v5, 0.0 }
 0x611   : > { %1769 = vadd.xlane.f32.xlu0 %v1768_v33 }
 0x69a   : > { %v1770_v34 = vpop.xlane.xlu0 %1769 }
 0x69b   : > { %v1771_v35 = vsel %vm1767_vm8, %v1770_v34, 0.0 }
 0x69c   : > { %v1772_v36 = vrot.slane %v1771_v35, 4 }
 0x69e   : > { %v1773_v37 = vadd.f32 %v1772_v36, %v1771_v35 }
 0x6a0   : > { %v1774_v38 = vrot.slane %v1773_v37, 2 }
 0x6a2   : > { %v1775_v39 = vadd.f32 %v1774_v38, %v1773_v37  ;;  %v4978_v38 = vmov 1966171168  }
 0x6a4   : > { %v1776_v40 = vrot.slane %v1775_v39, 1 }
 0x6a6   : > { %v1777_v41 = vadd.f32 %v1776_v40, %v1775_v39  ;;  %v1908_v39 = vunpack.c.l.s4 %v4978_v38  ;;  %v1800_v40 = vrot.slane %v5424_v23, %v5334_v56  ;;  %v4578_v38 = vld [vmem:[#allocation11 + $0x130] sm:$0xff]  }
 0x6a8   : > { %v1779_v42 = vmul.f32 0.015625, %v1777_v41 }
 0x6aa   : > { %v1780_v43 = vsub.f32 %v1762_v5, %v1779_v42  ;;  %v1805_v42 = vrot.slane %v5424_v23, %v5337_v57 }
 0x6ac   : > { %v5431_v45 = vmul.f32 %v5384_v22, %v1780_v43  ;;  %v4550_v22 = vld [vmem:[#allocation11 + $0xe8] sm:$0xff]  }
 0x6ad   : > { %4128 = vmatprep.subr.bf16.mxu1 %v4550_v22 }
 0x6ae   : > { %v1782_v47 = vmul.f32 %v5431_v45, %v5431_v45  ;;  %4129 = vmatpush3.bf16.msra.mxu1 %v4552_v62 }
 0x6af   : > { %4130 = vmatprep.subr.bf16.mxu1 %v4554_v1 }
 0x6b0   : > { %v1783_v49 = vsel %vm1767_vm8, %v1782_v47, 0.0  ;;  %v1909_v47 = vunpack.c.0.s8 %v1908_v39  ;;  %v4579_v39 = vld [vmem:[#allocation11 + $0x168] sm:$0xff]  }
 0x6b1   : > { %1784 = vadd.xlane.f32.xlu1 %v1783_v49 }
 0x6b2   : > { %4131 = vmatpush3.bf16.msra.mxu1 %v4556_v4  ;;  %v5443_v52 = vsub.s32 %v1909_v47, %v5300_v44  ;;  %v4585_v47 = vld [vmem:[#allocation11 + $0x150] sm:$0xff]  }
 0x6b3   : > { %4132 = vmatprep.subr.bf16.mxu1 %v4558_v7 }
 0x6b6   : > { %4133 = vmatpush3.bf16.msra.mxu1 %v4560_v11 }
 0x6b7   : > { %4134 = vmatprep.subr.bf16.mxu1 %v4562_v12 }
 0x6ba   : > { %4135 = vmatpush3.bf16.msra.mxu1 %v4564_v16 }
 0x6bb   : > { %4136 = vmatprep.subr.bf16.mxu1 %v4566_v15 }
 0x6be   : > { %4137 = vmatpush3.bf16.msra.mxu1 %v4568_v20 }
 0x6bf   : > { %4138 = vmatprep.subr.bf16.mxu1 %v4570_v21 }
 0x6c2   : > { %4139 = vmatpush3.bf16.msra.mxu1 %v4572_v24 }
 0x73a   : > { %v1785_v29 = vpop.xlane.xlu1 %1784 }
 0x73b   : > { %v1786_v30 = vsel %vm1767_vm8, %v1785_v29, 0.0 }
 0x73c   : > { %v1787_v31 = vrot.slane %v1786_v30, 4 }
 0x73e   : > { %v1788_v32 = vadd.f32 %v1787_v31, %v1786_v30 }
 0x740   : > { %v1789_v5 = vrot.slane %v1788_v32, 2 }
 0x742   : > { %v1790_v33 = vadd.f32 %v1789_v5, %v1788_v32 }
 0x744   : > { %v1791_v34 = vrot.slane %v1790_v33, 1 }
 0x746   : > { %v1792_v35 = vadd.f32 %v1791_v34, %v1790_v33 }
 0x748   : > { %v1793_v36 = vmul.f32 0.015625, %v1792_v35  ;;  %v4576_v35 = vld [vmem:[#allocation11 + $0x138] sm:$0xff]  }
 0x74a   : > { %v1794_v37 = vadd.f32 1e-05, %v1793_v36  ;;  %v4577_v36 = vld [vmem:[#allocation11 + $0x170] sm:$0xff]  }
 0x74c   : > { %4667 = vrsqrt.f32 %v1794_v37  ;;  %v2049_v37 = vrot.slane %v5418_v13, 1 }
 0x759   : > { %v4668_v41 = vpop.eup %4667 }
 0x75a   : > { %v1796_v43 = vmul.f32 %v4668_v41, %v5431_v45  ;;  %v4582_v41 = vld [vmem:[#allocation11 + $0x120] sm:$0xff]  }
 0x75c   : > { %v1801_v49 = vmul.f32 %v1800_v40, %v1796_v43  ;;  %v4581_v40 = vld [vmem:[#allocation11 + $0x160] sm:$0xff]   ;;  %v4584_v43 = vld [vmem:[#allocation11 + $0x118] sm:$0xff]  }
 0x75e   : > { %v1806_v50 = vadd.f32 %v1805_v42, %v1801_v49  ;;  %v4583_v42 = vld [vmem:[#allocation11 + $0x158] sm:$0xff]   ;;  %v4586_v49 = vld [vmem:[#allocation11 + $0x110] sm:$0xff]  }
 0x760   : > { %v1807_v53 = vmax.f32 %v1806_v50, 0.0  ;;  %v4587_v50 = vld [vmem:[#allocation11 + $0x148] sm:$0xff]  }
 0x762   : > { %v1808_v54 = vpack.c.bf16 %v1807_v53, %v1807_v53  ;;  %v2813_v53 = vshrl.u32 %v5350_v17, 16 }
 0x764   : > { %v1913_v55 = vrot.slane %v1808_v54, %v5443_v52  ;;  %v4588_v54 = vld [vmem:[#allocation11 + $0x108] sm:$0xff]  }
 0x766   : > { %v1914_v58 = vcombine.high %v1913_v55, %v1913_v55  ;;  %v1921_v59 = vrot.slane %v1913_v55, %v5443_v52  ;;  %v2043_v55 = vshll.u32 %v5418_v13, 16 }
 0x768   : > { %v1928_v22 = vrot.slane %v1914_v58, %v5443_v52  ;;  %v1930_v60 = vunpack.i.h.s16 %v1921_v59  ;;  %v3874_v61 = vpack.i.b16 %v1921_v59, %v1921_v59  ;;  %v4589_v58 = vld [vmem:[#allocation11 + $0x140] sm:$0xff]   ;;  %v5466_v59 = vrot.slane %v2813_v53, 7 }
 0x769   : > { %v4604_v53 = vld [vmem:[#allocation13 + $0xa0] sm:$0xff]  }
 0x76a   : > { %v1932_v23 = vunpack.i.h.s16 %v1928_v22  ;;  %v1934_v62 = vpack.i.b16 %v1930_v60, %v1930_v60  ;;  %v3875_v45 = vpack.i.b16 %v1928_v22, %v1928_v22  ;;  %v1940_v1 = vrot.slane %v3874_v61, %v5303_v46  ;;  %v4590_v22 = vld [vmem:[#allocation11 + $0x100] sm:$0xff]  }
 0x76b   : > { %v2045_v60 = vrot.slane %v2043_v55, 1  ;;  %v2816_v61 = vshll.u32 %v5350_v17, 16  ;;  %v4606_v55 = vld [vmem:[#allocation13 + $0xd8] sm:$0xff]  }
 0x76c   : > { %v1936_v2 = vpack.i.b16 %v1932_v23, %v1932_v23  ;;  %v1944_v44 = vrot.slane %v1934_v62, %v5303_v46  ;;  %v1948_v3 = vrot.slane %v3875_v45, %v5303_v46  ;;  %v1954_v4 = vpack.i.b16 %v1940_v1, %v1940_v1 }
 0x76d   : > { %v2041_v23 = vshrl.u32 %v5418_v13, 16  ;;  %v2818_v62 = vor.u32 %v2816_v61, %v5466_v59  ;;  %v5479_v13 = vld [vmem:[%s5632_s8] sm:$0x7]  ;;  %v4610_v61 = vld [vmem:[#allocation13 + $0xd0] sm:$0xff]  }
 0x76e   : > { %v1952_v7 = vrot.slane %v1936_v2, %v5303_v46  ;;  %v1961_v8 = vpack.i.b16 %v1944_v44, %v1944_v44  ;;  %v1968_v9 = vpack.i.b16 %v1948_v3, %v1948_v3  ;;  %v1959_v11 = vrot.slane %v1954_v4, %v5303_v46 }
 0x76f   : > { %v2046_v45 = vor.u32 %v2045_v60, %v2041_v23  ;;  %v5473_v1 = vsel %vm5286_vm3, 0, %v2818_v62  ;;  %v4611_v60 = vld [vmem:[#allocation13 + $0x18] sm:$0xff]   ;;  %v4613_v23 = vld [vmem:[#allocation13 + $0x50] sm:$0xff]  }
 0x770   : > { %v1966_v12 = vrot.slane %v1961_v8, %v5303_v46  ;;  %v1975_v14 = vpack.i.b16 %v1952_v7, %v1952_v7  ;;  %v1973_v48 = vrot.slane %v1968_v9, %v5303_v46  ;;  %v4612_v62 = vld [vmem:[#allocation13 + $0x90] sm:$0xff]  }
 0x772   : > { %v1980_v16 = vrot.slane %v1975_v14, %v5303_v46  ;;  %v1985_v15 = vcombine.low %v1959_v11, %v1966_v12  ;;  %v2054_v11 = vrot.slane %v5479_v13, %v5303_v46 }
 0x774   : > { %v1986_v18 = vcombine.low %v1973_v48, %v1980_v16  ;;  %v1993_v19 = vrot.slane %v1985_v15, %v5443_v52 }
 0x776   : > { %v2000_v20 = vrot.slane %v1986_v18, %v5443_v52 }
 0x778   : > { %v2001_v21 = vcombine.low %v1993_v19, %v2000_v20 }
 0x77a   : > { %v2008_v63 = vrot.slane %v2001_v21, %v5443_v52 }
 0x77c   : > { %v2010_v25 = vshrl.u32 %v2008_v63, 16  ;;  %v2013_v26 = vshll.u32 %v2008_v63, 16 }
 0x77e   : > { %v2012_v24 = vrot.slane %v2010_v25, 7 }
 0x780   : > { %v2015_v28 = vor.u32 %v2013_v26, %v2012_v24 }
 0x782   : > { %v2017_v29 = vsel %vm5286_vm3, 0, %v2015_v28 }
 0x783   : > { %v2018_v30 = vsel %vm5365_vm1, %v2017_v29, 0 }
 0x784   : > { %v2028_v31 = vrot.slane %v2018_v30, 1  ;;  %v2022_v32 = vshll.u32 %v2018_v30, 16  ;;  %v2020_v5 = vshrl.u32 %v2018_v30, 16 }
 0x786   : > { %2416 = vmatmul.mubr.bf16.vlgmr.msra.gmra.mxu1 %v2028_v31  ;;  %v2024_v33 = vrot.slane %v2022_v32, 1 }
 0x788   : > { %v2025_v34 = vor.u32 %v2024_v33, %v2020_v5 }
 0x78a   : > { %2375 = vmatprep.mubr.bf16.mxu0 %v2025_v34 }
 0x78b   : > { %2376 = vmatmul.mubr.bf16.vlgmr.msra.gmra.mxu0 %v2018_v30 }
 0x78c   : > { %4147 = vmatpush3.bf16.msra.mxu0 %v4576_v35  ;;  %2455 = vmatprep.mubr.bf16.mxu0 %v2049_v37  ;;  %v4591_v35 = vld [vmem:[#allocation13 + $0xf8] sm:$0xff]  }
 0x78d   : > { %4148 = vmatprep.subr.bf16.mxu0 %v4577_v36  ;;  %v4592_v36 = vld [vmem:[#allocation13 + $0xb8] sm:$0xff]  }
 0x78e   : > { %v4593_v37 = vld [vmem:[#allocation13 + $0x78] sm:$0xff]  }
 0x78f   : > { %4168 = vmatprep.subr.bf16.mxu1 %v4593_v37 }
 0x790   : > { %4149 = vmatpush3.bf16.msra.mxu0 %v4578_v38  ;;  %v4594_v38 = vld [vmem:[#allocation13 + $0xf0] sm:$0xff]  }
 0x791   : > { %4150 = vmatprep.subr.bf16.mxu0 %v4579_v39  ;;  %v4595_v39 = vld [vmem:[#allocation13 + $0x38] sm:$0xff]  }
 0x792   : > { %4169 = vmatpush3.bf16.msra.mxu1 %v4595_v39 }
 0x794   : > { %4151 = vmatpush3.bf16.msra.mxu0 %v4580_v51  ;;  %v4597_v51 = vld [vmem:[#allocation13 + $0x70] sm:$0xff]  }
 0x795   : > { %4152 = vmatprep.subr.bf16.mxu0 %v4581_v40  ;;  %v4596_v40 = vld [vmem:[#allocation13 + $0xb0] sm:$0xff]   ;;  %4170 = vmatprep.subr.bf16.mxu1 %v4597_v51 }
 0x798   : > { %4153 = vmatpush3.bf16.msra.mxu0 %v4582_v41  ;;  %v4599_v41 = vld [vmem:[#allocation13 + $0x30] sm:$0xff]  }
 0x799   : > { %4154 = vmatprep.subr.bf16.mxu0 %v4583_v42  ;;  %v4601_v42 = vld [vmem:[#allocation13 + $0x68] sm:$0xff]   ;;  %4171 = vmatpush3.bf16.msra.mxu1 %v4599_v41 }
 0x79a   : > { %4172 = vmatprep.subr.bf16.mxu1 %v4601_v42 }
 0x79c   : > { %4155 = vmatpush3.bf16.msra.mxu0 %v4584_v43  ;;  %v4600_v43 = vld [vmem:[#allocation13 + $0xa8] sm:$0xff]  }
 0x79d   : > { %4156 = vmatprep.subr.bf16.mxu0 %v4585_v47  ;;  %v4603_v47 = vld [vmem:[#allocation13 + $0x28] sm:$0xff]  }
 0x79e   : > { %4173 = vmatpush3.bf16.msra.mxu1 %v4603_v47 }
 0x7a0   : > { %4157 = vmatpush3.bf16.msra.mxu0 %v4586_v49  ;;  %v4602_v49 = vld [vmem:[#allocation13 + $0xe0] sm:$0xff]  }
 0x7a1   : > { %4158 = vmatprep.subr.bf16.mxu0 %v4587_v50  ;;  %v4605_v50 = vld [vmem:[#allocation13 + $0x60] sm:$0xff]  }
 0x7a2   : > { %4174 = vmatprep.subr.bf16.mxu1 %v4605_v50 }
 0x7a4   : > { %4159 = vmatpush3.bf16.msra.mxu0 %v4588_v54  ;;  %v4607_v54 = vld [vmem:[#allocation13 + $0x20] sm:$0xff]  }
 0x7a5   : > { %4160 = vmatprep.subr.bf16.mxu0 %v4589_v58  ;;  %v4609_v58 = vld [vmem:[#allocation13 + $0x58] sm:$0xff]   ;;  %4175 = vmatpush3.bf16.msra.mxu1 %v4607_v54 }
 0x7a6   : > { %4176 = vmatprep.subr.bf16.mxu1 %v4609_v58 }
 0x7a8   : > { %4161 = vmatpush3.bf16.msra.mxu0 %v4590_v22  ;;  %v4608_v22 = vld [vmem:[#allocation13 + $0x98] sm:$0xff]  }
 0x7a9   : > { %4190 = vmatprep.subr.bf16.mxu0 %v4591_v35  ;;  %4177 = vmatpush3.bf16.msra.mxu1 %v4611_v60 }
 0x7aa   : > { %4178 = vmatprep.subr.bf16.mxu1 %v4613_v23 }
 0x7ab   : > { %2456 = vmatmul.mubr.bf16.vlgmr.msra.gmra.mxu0 %v2046_v45  ;;  %v4615_v45 = vld [vmem:[#allocation13 + $0x10] sm:$0xff]  }
 0x7ac   : > { %3207 = vmatprep.mubr.bf16.mxu0 %v5473_v1  ;;  %4191 = vmatpush3.bf16.msra.mxu0 %v4592_v36 }
 0x7ad   : > { %4192 = vmatprep.subr.bf16.mxu0 %v4594_v38  ;;  %4179 = vmatpush3.bf16.msra.mxu1 %v4615_v45 }
 0x7b0   : > { %4193 = vmatpush3.bf16.msra.mxu0 %v4596_v40 }
 0x846   : > { %v4140_v2 = vpop.f32.mrf.mxu1 }
 0x848   : > { %v4141_v44 = vpop.f32.mrf.mxu1 }
 0x849   : > { %v4142_v16 = vadd.f32 %v4141_v44, %v4140_v2  ;;  %v4614_v2 = vld [vmem:[#allocation13 + $0xc8] sm:$0xff]  }
 0x84a   : > { %v4143_v3 = vpop.f32.mrf.mxu1  ;;  %v4617_v44 = vld [vmem:[#allocation13 + $0x48] sm:$0xff]  }
 0x84b   : > { %v4118_v4 = vpop.f32.mrf.mxu0  ;;  %v4616_v3 = vld [vmem:[#allocation13 + $0x88] sm:$0xff]   ;;  %4180 = vmatprep.subr.bf16.mxu1 %v4617_v44 }
 0x84c   : > { %v4144_v7 = vpop.f32.mrf.mxu1 }
 0x84d   : > { %v4119_v8 = vpop.f32.mrf.mxu0  ;;  %v4618_v7 = vld [vmem:[#allocation13 + $0xc0] sm:$0xff]  }
 0x84e   : > { %v4120_v12 = vadd.f32 %v4119_v8, %v4118_v4  ;;  %v4619_v4 = vld [vmem:[#allocation13 + $0x8] sm:$0xff]   ;;  %v4621_v8 = vld [vmem:[#allocation13 + $0x40] sm:$0xff]  }
 0x84f   : > { %v4121_v17 = vpop.f32.mrf.mxu0  ;;  %4181 = vmatpush3.bf16.msra.mxu1 %v4619_v4 }
 0x850   : > { %v2378_v14 = vadd.f32 %v4120_v12, %v2054_v11  ;;  %v4620_v17 = vld [vmem:[#allocation13 + $0x80] sm:$0xff]   ;;  %4182 = vmatprep.subr.bf16.mxu1 %v4621_v8  ;;  %v4623_v11 = vld [vmem:[#allocation13 + $0x178] sm:$0xff]  }
 0x851   : > { %v4122_v9 = vpop.f32.mrf.mxu0 }
 0x852   : > { %v2418_v19 = vadd.f32 %v4142_v16, %v2378_v14  ;;  %v4622_v9 = vld [vmem:[#allocation13] sm:$0xff]  }
 0x853   : > { %4183 = vmatpush3.bf16.msra.mxu1 %v4622_v9 }
 0x854   : > { %4212 = vmatprep.subr.bf16.mxu1 %v4623_v11 }
 0x86b   : > { %v4162_v48 = vpop.f32.mrf.mxu0 }
 0x86d   : > { %v4163_v15 = vpop.f32.mrf.mxu0 }
 0x86e   : > { %v4164_v18 = vadd.f32 %v4163_v15, %v4162_v48 }
 0x86f   : > { %v4165_v20 = vpop.f32.mrf.mxu0 }
 0x870   : > { %v2458_v21 = vadd.f32 %v4164_v18, %v2418_v19 }
 0x871   : > { %v4166_v63 = vpop.f32.mrf.mxu0 }
 0x872   : > { %2463 = vadd.xlane.f32.xlu0 %v2458_v21  ;;  %v2490_v63 = vrot.slane %v5479_v13, %v5334_v56 }
 0x8fb   : > { %v2464_v25 = vpop.xlane.xlu0 %2463 }
 0x8fc   : > { %v2465_v24 = vrot.slane %v2464_v25, 4 }
 0x8fe   : > { %v2466_v26 = vadd.f32 %v2465_v24, %v2464_v25  ;;  %v2495_v24 = vrot.slane %v5479_v13, %v5337_v57 }
 0x900   : > { %v2467_v28 = vrot.slane %v2466_v26, 2 }
 0x902   : > { %v2468_v29 = vadd.f32 %v2467_v28, %v2466_v26 }
 0x904   : > { %v2469_v30 = vrot.slane %v2468_v29, 1 }
 0x906   : > { %v2470_v31 = vadd.f32 %v2469_v30, %v2468_v29 }
 0x908   : > { %v2471_v32 = vmul.f32 0.015625, %v2470_v31 }
 0x90a   : > { %v2472_v5 = vsub.f32 %v2458_v21, %v2471_v32 }
 0x90c   : > { %v5484_v33 = vmul.f32 %v5313_v10, %v2472_v5  ;;  %v4598_v10 = vld [vmem:[#allocation13 + $0xe8] sm:$0xff]  }
 0x90d   : > { %4194 = vmatprep.subr.bf16.mxu0 %v4598_v10 }
 0x90e   : > { %v2474_v34 = vmul.f32 %v5484_v33, %v5484_v33  ;;  %4195 = vmatpush3.bf16.msra.mxu0 %v4600_v43 }
 0x90f   : > { %4196 = vmatprep.subr.bf16.mxu0 %v4602_v49 }
 0x910   : > { %2475 = vadd.xlane.f32.xlu1 %v2474_v34 }
 0x912   : > { %4197 = vmatpush3.bf16.msra.mxu0 %v4604_v53 }
 0x913   : > { %4198 = vmatprep.subr.bf16.mxu0 %v4606_v55 }
 0x916   : > { %4199 = vmatpush3.bf16.msra.mxu0 %v4608_v22 }
 0x917   : > { %4200 = vmatprep.subr.bf16.mxu0 %v4610_v61 }
 0x91a   : > { %4201 = vmatpush3.bf16.msra.mxu0 %v4612_v62 }
 0x91b   : > { %4202 = vmatprep.subr.bf16.mxu0 %v4614_v2 }
 0x91e   : > { %4203 = vmatpush3.bf16.msra.mxu0 %v4616_v3 }
 0x91f   : > { %4204 = vmatprep.subr.bf16.mxu0 %v4618_v7 }
 0x922   : > { %4205 = vmatpush3.bf16.msra.mxu0 %v4620_v17 }
 0x999   : > { %v2476_v12 = vpop.xlane.xlu1 %2475 }
 0x99a   : > { %v2477_v14 = vrot.slane %v2476_v12, 4 }
 0x99c   : > { %v2478_v48 = vadd.f32 %v2477_v14, %v2476_v12 }
 0x99e   : > { %v2479_v16 = vrot.slane %v2478_v48, 2 }
 0x9a0   : > { %v2480_v15 = vadd.f32 %v2479_v16, %v2478_v48 }
 0x9a2   : > { %v2481_v18 = vrot.slane %v2480_v15, 1 }
 0x9a4   : > { %v2482_v19 = vadd.f32 %v2481_v18, %v2480_v15 }
 0x9a6   : > { %v2483_v20 = vmul.f32 0.015625, %v2482_v19 }
 0x9a8   : > { %v2484_v21 = vadd.f32 1e-05, %v2483_v20 }
 0x9aa   : > { %4669 = vrsqrt.f32 %v2484_v21 }
 0x9b7   : > { %v4670_v25 = vpop.eup %4669 }
 0x9b8   : > { %v2486_v26 = vmul.f32 %v4670_v25, %v5484_v33 }
 0x9ba   : > { %v2491_v28 = vmul.f32 %v2490_v63, %v2486_v26 }
 0x9bc   : > { %v2496_v29 = vadd.f32 %v2495_v24, %v2491_v28 }
 0x9be   : > { %v2497_v30 = vmax.f32 %v2496_v29, 0.0 }
 0x9c0   : > { %v2498_v31 = vpack.c.bf16 %v2497_v30, %v2497_v30 }
 0x9c2   : > { %v2603_v32 = vrot.slane %v2498_v31, %v5443_v52 }
 0x9c4   : > { %v2604_v5 = vcombine.high %v2603_v32, %v2603_v32  ;;  %v2611_v34 = vrot.slane %v2603_v32, %v5443_v52 }
 0x9c6   : > { %v2618_v35 = vrot.slane %v2604_v5, %v5443_v52  ;;  %v2619_v36 = vcombine.high %v2611_v34, %v2611_v34  ;;  %v2622_v37 = vunpack.i.h.s16 %v2611_v34  ;;  %v3924_v38 = vpack.i.b16 %v2611_v34, %v2611_v34 }
 0x9c8   : > { %v2620_v39 = vcombine.high %v2618_v35, %v2618_v35  ;;  %v2624_v51 = vunpack.i.h.s16 %v2618_v35  ;;  %v2626_v40 = vunpack.i.h.s16 %v2619_v36  ;;  %v2630_v13 = vpack.i.b16 %v2622_v37, %v2622_v37 }
 0x9c9   : > { %v3925_v41 = vpack.i.b16 %v2618_v35, %v2618_v35  ;;  %v3926_v33 = vpack.i.b16 %v2619_v36, %v2619_v36  ;;  %v2640_v10 = vrot.slane %v3924_v38, %v5303_v46 }
 0x9ca   : > { %v2628_v42 = vunpack.i.h.s16 %v2620_v39  ;;  %v2632_v43 = vpack.i.b16 %v2624_v51, %v2624_v51  ;;  %v2634_v47 = vpack.i.b16 %v2626_v40, %v2626_v40  ;;  %v3927_v49 = vpack.i.b16 %v2620_v39, %v2620_v39 }
 0x9cb   : > { %v2644_v50 = vrot.slane %v2630_v13, %v5303_v46  ;;  %v2648_v53 = vrot.slane %v3925_v41, %v5303_v46  ;;  %v2656_v54 = vrot.slane %v3926_v33, %v5303_v46  ;;  %v2670_v55 = vpack.i.b16 %v2640_v10, %v2640_v10 }
 0x9cc   : > { %v2636_v58 = vpack.i.b16 %v2628_v42, %v2628_v42  ;;  %v2652_v22 = vrot.slane %v2632_v43, %v5303_v46  ;;  %v2660_v60 = vrot.slane %v2634_v47, %v5303_v46  ;;  %v2664_v61 = vrot.slane %v3927_v49, %v5303_v46  ;;  %v4624_v47 = vld [vmem:[#allocation13 + $0x138] sm:$0xff]  }
 0x9cd   : > { %v2677_v23 = vpack.i.b16 %v2644_v50, %v2644_v50  ;;  %v2684_v62 = vpack.i.b16 %v2648_v53, %v2648_v53  ;;  %v2698_v45 = vpack.i.b16 %v2656_v54, %v2656_v54  ;;  %v2675_v7 = vrot.slane %v2670_v55, %v5303_v46  ;;  %v4625_v53 = vld [vmem:[#allocation13 + $0x170] sm:$0xff]  }
 0x9ce   : > { %v2668_v2 = vrot.slane %v2636_v58, %v5303_v46  ;;  %v2691_v44 = vpack.i.b16 %v2652_v22, %v2652_v22  ;;  %v2705_v3 = vpack.i.b16 %v2660_v60, %v2660_v60  ;;  %v2712_v4 = vpack.i.b16 %v2664_v61, %v2664_v61  ;;  %v4626_v55 = vld [vmem:[#allocation13 + $0x130] sm:$0xff]   ;;  %v4627_v58 = vld [vmem:[#allocation13 + $0x168] sm:$0xff]   ;;  %v4629_v22 = vld [vmem:[#allocation13 + $0x160] sm:$0xff]  }
 0x9cf   : > { %v2682_v8 = vrot.slane %v2677_v23, %v5303_v46  ;;  %v2689_v17 = vrot.slane %v2684_v62, %v5303_v46  ;;  %v2703_v11 = vrot.slane %v2698_v45, %v5303_v46  ;;  %v2838_v43 = vrot.slane %v5473_v1, 1  ;;  %v4630_v60 = vld [vmem:[#allocation13 + $0x120] sm:$0xff]   ;;  %v4631_v61 = vld [vmem:[#allocation13 + $0x158] sm:$0xff]   ;;  %v4633_v62 = vld [vmem:[#allocation13 + $0x150] sm:$0xff]  }
 0x9d0   : > { %v2696_v9 = vrot.slane %v2691_v44, %v5303_v46  ;;  %v2710_v12 = vrot.slane %v2705_v3, %v5303_v46  ;;  %v2719_v14 = vpack.i.b16 %v2668_v2, %v2668_v2  ;;  %v2717_v16 = vrot.slane %v2712_v4, %v5303_v46  ;;  %v4632_v23 = vld [vmem:[#allocation13 + $0x118] sm:$0xff]   ;;  %v4634_v45 = vld [vmem:[#allocation13 + $0x110] sm:$0xff]   ;;  %v4635_v2 = vld [vmem:[#allocation13 + $0x148] sm:$0xff]  }
 0x9d1   : > { %v2733_v48 = vcombine.low %v2675_v7, %v2682_v8  ;;  %v2826_v44 = vshll.u32 %v5473_v1, 16  ;;  %v4636_v3 = vld [vmem:[#allocation13 + $0x108] sm:$0xff]   ;;  %v4637_v4 = vld [vmem:[#allocation13 + $0x140] sm:$0xff]   ;;  %v2824_v8 = vshrl.u32 %v5473_v1, 16 }
 0x9d2   : > { %v2724_v15 = vrot.slane %v2719_v14, %v5303_v46  ;;  %v2734_v18 = vcombine.low %v2689_v17, %v2696_v9  ;;  %v2735_v19 = vcombine.low %v2703_v11, %v2710_v12  ;;  %v4638_v9 = vld [vmem:[#allocation13 + $0x100] sm:$0xff]   ;;  %v5538_v1 = vld [vmem:[%s5634_s10] sm:$0x7] }
 0x9d3   : > { %v2743_v21 = vrot.slane %v2733_v48, %v5443_v52  ;;  %v2828_v7 = vrot.slane %v2826_v44, 1  ;;  %v4644_v44 = vld [vmem:[#allocation14 + $0xa8] sm:$0xff]  }
 0x9d4   : > { %v2736_v20 = vcombine.low %v2717_v16, %v2724_v15  ;;  %v2750_v63 = vrot.slane %v2734_v18, %v5443_v52  ;;  %v2757_v25 = vrot.slane %v2735_v19, %v5443_v52 }
 0x9d5   : > { %v2829_v11 = vor.u32 %v2828_v7, %v2824_v8  ;;  %v4647_v7 = vld [vmem:[#allocation14 + $0xa0] sm:$0xff]  }
 0x9d6   : > { %v2764_v24 = vrot.slane %v2736_v20, %v5443_v52  ;;  %v2765_v26 = vcombine.low %v2743_v21, %v2750_v63  ;;  %v2845_v20 = vrot.slane %v5538_v1, %v5303_v46  ;;  %v4651_v8 = vld [vmem:[#allocation14 + $0x20] sm:$0xff]  }
 0x9d8   : > { %v2766_v28 = vcombine.low %v2757_v25, %v2764_v24  ;;  %v2773_v29 = vrot.slane %v2765_v26, %v5443_v52 }
 0x9da   : > { %v2780_v30 = vrot.slane %v2766_v28, %v5443_v52  ;;  %v2822_v52 = vsel %vm5286_vm3, %v5466_v59, 0  ;;  %v4628_v59 = vld [vmem:[#allocation13 + $0x128] sm:$0xff]  }
 0x9db   : > { %v2839_v50 = vrot.slane %v2822_v52, 1  ;;  %v2831_v17 = vshll.u32 %v2822_v52, 16 }
 0x9dc   : > { %v2781_v31 = vcombine.low %v2773_v29, %v2780_v30 }
 0x9dd   : > { %v2840_v54 = vsel %vm646_vm5, %v2838_v43, %v2839_v50  ;;  %v2833_v12 = vrot.slane %v2831_v17, 1  ;;  %v4652_v17 = vld [vmem:[#allocation14 + $0x58] sm:$0xff]  }
 0x9de   : > { %v2783_v32 = vshrl.u32 %v2781_v31, 16  ;;  %v2786_v34 = vshll.u32 %v2781_v31, 16 }
 0x9df   : > { %v2834_v14 = vsel %vm630_vm4, %v2829_v11, %v2833_v12  ;;  %v4654_v11 = vld [vmem:[#allocation14 + $0x18] sm:$0xff]   ;;  %v4655_v12 = vld [vmem:[#allocation14 + $0x50] sm:$0xff]  }
 0x9e0   : > { %v2785_v5 = vrot.slane %v2783_v32, 7 }
 0x9e2   : > { %v2788_v35 = vor.u32 %v2786_v34, %v2785_v5  ;;  %v2792_v36 = vsel %vm5286_vm3, %v2785_v5, 0 }
 0x9e3   : > { %v2809_v39 = vrot.slane %v2792_v36, 1  ;;  %v2801_v40 = vshll.u32 %v2792_v36, 16 }
 0x9e4   : > { %v2791_v37 = vsel %vm5286_vm3, 0, %v2788_v35 }
 0x9e5   : > { %v2808_v38 = vrot.slane %v2791_v37, 1  ;;  %v2796_v51 = vshll.u32 %v2791_v37, 16  ;;  %v2794_v41 = vshrl.u32 %v2791_v37, 16  ;;  %v2803_v42 = vrot.slane %v2801_v40, 1 }
 0x9e7   : > { %v2810_v13 = vsel %vm646_vm5, %v2808_v38, %v2809_v39  ;;  %v2798_v33 = vrot.slane %v2796_v51, 1 }
 0x9e8   : > { %3208 = vmatmul.mubr.bf16.vlgmr.msra.gmra.mxu0 %v2810_v13 }
 0x9e9   : > { %v2799_v10 = vor.u32 %v2798_v33, %v2794_v41 }
 0x9eb   : > { %v2804_v49 = vsel %vm630_vm4, %v2799_v10, %v2803_v42 }
 0x9ec   : > { %3166 = vmatprep.mubr.bf16.mxu1 %v2804_v49 }
 0x9ed   : > { %3167 = vmatmul.mubr.bf16.vlgmr.msra.gmra.mxu1 %v2791_v37 }
 0x9ee   : > { %4213 = vmatpush3.bf16.msra.mxu1 %v4624_v47  ;;  %3248 = vmatprep.mubr.bf16.mxu1 %v2840_v54 }
 0x9ef   : > { %4214 = vmatprep.subr.bf16.mxu1 %v4625_v53 }
 0x9f2   : > { %4215 = vmatpush3.bf16.msra.mxu1 %v4626_v55 }
 0x9f3   : > { %4216 = vmatprep.subr.bf16.mxu1 %v4627_v58 }
 0x9f6   : > { %4217 = vmatpush3.bf16.msra.mxu1 %v4628_v59 }
 0x9f7   : > { %4218 = vmatprep.subr.bf16.mxu1 %v4629_v22 }
 0x9fa   : > { %4219 = vmatpush3.bf16.msra.mxu1 %v4630_v60  ;;  %v4639_v60 = vld [vmem:[#allocation14 + $0xb8] sm:$0xff]  }
 0x9fb   : > { %4220 = vmatprep.subr.bf16.mxu1 %v4631_v61  ;;  %v4640_v61 = vld [vmem:[#allocation14 + $0x78] sm:$0xff]  }
 0x9fc   : > { %4234 = vmatprep.subr.bf16.mxu0 %v4640_v61 }
 0x9fe   : > { %4221 = vmatpush3.bf16.msra.mxu1 %v4632_v23  ;;  %v4643_v23 = vld [vmem:[#allocation14 + $0x70] sm:$0xff]  }
 0x9ff   : > { %4222 = vmatprep.subr.bf16.mxu1 %v4633_v62  ;;  %v4641_v62 = vld [vmem:[#allocation14 + $0xb0] sm:$0xff]  }
 0xa02   : > { %4223 = vmatpush3.bf16.msra.mxu1 %v4634_v45  ;;  %v4645_v45 = vld [vmem:[#allocation14 + $0x30] sm:$0xff]  }
 0xa03   : > { %4224 = vmatprep.subr.bf16.mxu1 %v4635_v2  ;;  %v4646_v2 = vld [vmem:[#allocation14 + $0x68] sm:$0xff]  }
 0xa06   : > { %4225 = vmatpush3.bf16.msra.mxu1 %v4636_v3  ;;  %v4648_v3 = vld [vmem:[#allocation14 + $0x28] sm:$0xff]  }
 0xa07   : > { %4226 = vmatprep.subr.bf16.mxu1 %v4637_v4  ;;  %v4649_v4 = vld [vmem:[#allocation14 + $0x60] sm:$0xff]  }
 0xa0a   : > { %4227 = vmatpush3.bf16.msra.mxu1 %v4638_v9  ;;  %v4650_v9 = vld [vmem:[#allocation14 + $0x98] sm:$0xff]  }
 0xa0b   : > { %4325 = vmatprep.subr.bf16.mxu1 %v4975_v0 }
 0xa0d   : > { %3249 = vmatmul.mubr.bf16.vlgmr.msra.gmra.mxu1 %v2834_v14  ;;  %v4653_v14 = vld [vmem:[#allocation14 + $0x90] sm:$0xff]  }
 0xa0e   : > { %4341 = vmatprep.mubr.msk.bf16.mxu1 %vm4976_vm0, %v4975_v0  ;;  %vm3257_vm0 = vcmp.lt.s32.totalorder %v5309_v6, 4  ;;  %v4642_v6 = vld [vmem:[#allocation14 + $0x38] sm:$0xff]   ;;  %4326 = vmatpush3.bf16.msra.mxu1 %v4639_v60 }
 0xa0f   : > { %v3976_v50 = vsel %vm3257_vm0, 1.0, %v4975_v0  ;;  %4327 = vmatprep.subr.bf16.mxu1 %v4975_v0  ;;  %4235 = vmatpush3.bf16.msra.mxu0 %v4642_v6 }
 0xa10   : > { %4236 = vmatprep.subr.bf16.mxu0 %v4643_v23 }
 0xa12   : > { %4328 = vmatpush3.bf16.msra.mxu1 %v4641_v62  ;;  %v3977_v62 = vld [vmem:[%s5636_s12] ss:$0 sm:$0xff] }
 0xa13   : > { %4329 = vmatprep.subr.bf16.mxu1 %v4975_v0  ;;  %4237 = vmatpush3.bf16.msra.mxu0 %v4645_v45 }
 0xa14   : > { %4238 = vmatprep.subr.bf16.mxu0 %v4646_v2 }
 0xa16   : > { %4330 = vmatpush3.bf16.msra.mxu1 %v4644_v44 }
 0xa17   : > { %4331 = vmatprep.subr.bf16.mxu1 %v4975_v0  ;;  %4239 = vmatpush3.bf16.msra.mxu0 %v4648_v3 }
 0xa18   : > { %4240 = vmatprep.subr.bf16.mxu0 %v4649_v4 }
 0xa1a   : > { %4332 = vmatpush3.bf16.msra.mxu1 %v4647_v7 }
 0xa1b   : > { %4333 = vmatprep.subr.bf16.mxu1 %v4975_v0  ;;  %4241 = vmatpush3.bf16.msra.mxu0 %v4651_v8 }
 0xa1c   : > { %4242 = vmatprep.subr.bf16.mxu0 %v4652_v17 }
 0xa1e   : > { %4334 = vmatpush3.bf16.msra.mxu1 %v4650_v9 }
 0xa1f   : > { %4335 = vmatprep.subr.bf16.mxu1 %v4975_v0  ;;  %4243 = vmatpush3.bf16.msra.mxu0 %v4654_v11 }
 0xa20   : > { %4244 = vmatprep.subr.bf16.mxu0 %v4655_v12 }
 0xa22   : > { %4336 = vmatpush3.bf16.msra.mxu1 %v4653_v14 }
 0xa23   : > { %4337 = vmatprep.subr.bf16.mxu1 %v4975_v0 }
 0xaa8   : > { %v4206_v15 = vpop.f32.mrf.mxu0 }
 0xaaa   : > { %v4207_v19 = vpop.f32.mrf.mxu0 }
 0xaab   : > { %v4208_v29 = vadd.f32 %v4207_v19, %v4206_v15  ;;  %v4656_v15 = vld [vmem:[#allocation14 + $0x88] sm:$0xff]   ;;  %v4659_v19 = vld [vmem:[#allocation14 + $0x80] sm:$0xff]  }
 0xaac   : > { %v4209_v25 = vpop.f32.mrf.mxu0  ;;  %4338 = vmatpush3.bf16.msra.mxu1 %v4656_v15 }
 0xaad   : > { %v4184_v48 = vpop.f32.mrf.mxu1  ;;  %4339 = vmatprep.subr.bf16.mxu1 %v4975_v0  ;;  %v3297_v0 = vrot.slane %v5538_v1, %v5334_v56 }
 0xaae   : > { %v4210_v30 = vpop.f32.mrf.mxu0 }
 0xaaf   : > { %v4185_v16 = vpop.f32.mrf.mxu1  ;;  %v4211_v36 = vadd.f32 %v4210_v30, %v4209_v25 }
 0xab0   : > { %v4186_v21 = vadd.f32 %v4185_v16, %v4184_v48  ;;  %v4657_v48 = vld [vmem:[#allocation14 + $0x10] sm:$0xff]   ;;  %v4658_v16 = vld [vmem:[#allocation14 + $0x48] sm:$0xff]   ;;  %4340 = vmatpush3.bf16.msra.mxu1 %v4659_v19 }
 0xab1   : > { %v4187_v18 = vpop.f32.mrf.mxu1  ;;  %4245 = vmatpush3.bf16.msra.mxu0 %v4657_v48 }
 0xab2   : > { %v3169_v24 = vadd.f32 %v4186_v21, %v2845_v20  ;;  %4246 = vmatprep.subr.bf16.mxu0 %v4658_v16  ;;  %v4662_v21 = vld [vmem:[#allocation14] sm:$0xff]  }
 0xab3   : > { %v4188_v63 = vpop.f32.mrf.mxu1 }
 0xab4   : > { %v4189_v26 = vadd.f32 %v4188_v63, %v4187_v18  ;;  %v3210_v34 = vadd.f32 %v4208_v29, %v3169_v24  ;;  %v4660_v18 = vld [vmem:[#allocation14 + $0x8] sm:$0xff]  }
 0xab5   : > { %4247 = vmatpush3.bf16.msra.mxu0 %v4660_v18 }
 0xab6   : > { %v3172_v32 = vadd.f32 %v4189_v26, %v2845_v20  ;;  %v4661_v20 = vld [vmem:[#allocation14 + $0x40] sm:$0xff]  }
 0xab7   : > { %4248 = vmatprep.subr.bf16.mxu0 %v4661_v20 }
 0xab8   : > { %v3213_v51 = vadd.f32 %v4211_v36, %v3172_v32  ;;  %v3303_v36 = vrot.slane %v5538_v1, %v5337_v57 }
 0xab9   : > { %4249 = vmatpush3.bf16.msra.mxu0 %v4662_v21 }
 0xacd   : > { %v4228_v28 = vpop.f32.mrf.mxu1 }
 0xacf   : > { %v4229_v31 = vpop.f32.mrf.mxu1 }
 0xad0   : > { %v4230_v5 = vadd.f32 %v4229_v31, %v4228_v28 }
 0xad1   : > { %v4231_v35 = vpop.f32.mrf.mxu1 }
 0xad2   : > { %v3251_v37 = vadd.f32 %v4230_v5, %v3210_v34 }
 0xad3   : > { %v4232_v38 = vpop.f32.mrf.mxu1 }
 0xad4   : > { %v4233_v39 = vadd.f32 %v4232_v38, %v4231_v35  ;;  %3260 = vadd.xlane.f32.xlu0 %v3251_v37 }
 0xad6   : > { %v3254_v46 = vadd.f32 %v4233_v39, %v3213_v51 }
 0xad8   : > { %3262 = vadd.xlane.f32.xlu1 %v3254_v46 }
 0xb5d   : > { %v3261_v40 = vpop.xlane.xlu0 %3260 }
 0xb61   : > { %v3263_v13 = vpop.xlane.xlu1 %3262 }
 0xb62   : > { %v3264_v41 = vadd.f32 %v3263_v13, %v3261_v40 }
 0xb64   : > { %v3265_v33 = vrot.slane %v3264_v41, 4 }
 0xb66   : > { %v3266_v52 = vadd.f32 %v3265_v33, %v3264_v41 }
 0xb68   : > { %v3267_v10 = vrot.slane %v3266_v52, 2 }
 0xb6a   : > { %v3268_v42 = vadd.f32 %v3267_v10, %v3266_v52 }
 0xb6c   : > { %v3269_v43 = vrot.slane %v3268_v42, 1 }
 0xb6e   : > { %v3270_v47 = vadd.f32 %v3269_v43, %v3268_v42 }
 0xb70   : > { %v3271_v49 = vmul.f32 0.015625, %v3270_v47 }
 0xb72   : > { %v3273_v53 = vsub.f32 %v3254_v46, %v3271_v49  ;;  %v3272_v54 = vsub.f32 %v3251_v37, %v3271_v49 }
 0xb74   : > { %v5544_v55 = vmul.f32 %v3976_v50, %v3273_v53  ;;  %v5546_v58 = vmul.f32 %v3976_v50, %v3272_v54 }
 0xb76   : > { %v3277_v59 = vmul.f32 %v5544_v55, %v5544_v55  ;;  %v3276_v22 = vmul.f32 %v5546_v58, %v5546_v58 }
 0xb78   : > { %3280 = vadd.xlane.f32.xlu1 %v3277_v59  ;;  %3278 = vadd.xlane.f32.xlu0 %v3276_v22 }
 0xc01   : > { %v3281_v63 = vpop.xlane.xlu1 %3280  ;;  %v3279_v25 = vpop.xlane.xlu0 %3278 }
 0xc02   : > { %v3282_v24 = vadd.f32 %v3281_v63, %v3279_v25 }
 0xc04   : > { %v3283_v26 = vrot.slane %v3282_v24, 4 }
 0xc06   : > { %v3284_v28 = vadd.f32 %v3283_v26, %v3282_v24 }
 0xc08   : > { %v3285_v29 = vrot.slane %v3284_v28, 2 }
 0xc0a   : > { %v3286_v30 = vadd.f32 %v3285_v29, %v3284_v28 }
 0xc0c   : > { %v3287_v31 = vrot.slane %v3286_v30, 1 }
 0xc0e   : > { %v3288_v32 = vadd.f32 %v3287_v31, %v3286_v30 }
 0xc10   : > { %v3289_v5 = vmul.f32 0.015625, %v3288_v32 }
 0xc12   : > { %v3290_v34 = vadd.f32 1e-05, %v3289_v5 }
 0xc14   : > { %4671 = vrsqrt.f32 %v3290_v34 }
 0xc21   : > { %v4672_v35 = vpop.eup %4671 }
 0xc22   : > { %v3292_v37 = vmul.f32 %v4672_v35, %v5546_v58  ;;  %v3293_v38 = vmul.f32 %v4672_v35, %v5544_v55 }
 0xc24   : > { %v3298_v39 = vmul.f32 %v3297_v0, %v3292_v37  ;;  %v3299_v51 = vmul.f32 %v3297_v0, %v3293_v38 }
 0xc26   : > { %v3304_v46 = vadd.f32 %v3303_v36, %v3298_v39  ;;  %v3305_v40 = vadd.f32 %v3303_v36, %v3299_v51 }
 0xc28   : > { %v3306_v13 = vmax.f32 %v3304_v46, 0.0  ;;  %v3307_v41 = vmax.f32 %v3305_v40, 0.0 }
 0xc2a   : > { %v3308_v33 = vpack.c.bf16 %v3307_v41, %v3306_v13 }
 0xc2c   : > { %v3359_v52 = vshrl.u32 %v3308_v33, 16  ;;  %v3362_v42 = vshll.u32 %v3308_v33, 16 }
 0xc2e   : > { %v3361_v10 = vrot.slane %v3359_v52, 7 }
 0xc30   : > { %v3364_v43 = vor.u32 %v3362_v42, %v3361_v10  ;;  %v3368_v56 = vsel %vm5286_vm3, %v3361_v10, 0 }
 0xc31   : > { %v3385_v47 = vrot.slane %v3368_v56, 1  ;;  %v3377_v50 = vshll.u32 %v3368_v56, 16 }
 0xc32   : > { %v3367_v57 = vsel %vm5286_vm3, 0, %v3364_v43 }
 0xc33   : > { %v3384_v1 = vrot.slane %v3367_v57, 1  ;;  %v3372_v49 = vshll.u32 %v3367_v57, 16  ;;  %v3370_v54 = vshrl.u32 %v3367_v57, 16  ;;  %v3379_v59 = vrot.slane %v3377_v50, 1 }
 0xc35   : > { %v3386_v53 = vsel %vm646_vm5, %v3384_v1, %v3385_v47  ;;  %v3374_v55 = vrot.slane %v3372_v49, 1 }
 0xc36   : > { %4342 = vmatmul.mubr.bf16.vlgmr.msra.gmra.mxu1 %v3386_v53 }
 0xc37   : > { %v3375_v58 = vor.u32 %v3374_v55, %v3370_v54 }
 0xc39   : > { %v3380_v22 = vsel %vm630_vm4, %v3375_v58, %v3379_v59 }
 0xc3a   : > { %3570 = vmatprep.mubr.bf16.mxu0 %v3380_v22 }
 0xc3b   : > { %3571 = vmatmul.mubr.bf16.vlgmr.msra.gmra.mxu0 %v3367_v57 }
 0xcf6   : > { %v3613_v60 = vpop.f32.mrf.mxu1 }
 0xcf8   : > { %v4343_v27 = vpop.f32.mrf.mxu1 }
 0xcfa   : > { %v3616_v61 = vpop.f32.mrf.mxu1 }
 0xcfb   : > { %v4250_v6 = vpop.f32.mrf.mxu0 }
 0xcfc   : > { %v4344_v23 = vpop.f32.mrf.mxu1 }
 0xcfd   : > { %v4251_v45 = vpop.f32.mrf.mxu0 }
 0xcfe   : > { %v4252_v2 = vadd.f32 %v4251_v45, %v4250_v6 }
 0xcff   : > { %v4253_v44 = vpop.f32.mrf.mxu0 }
 0xd00   : > { %v3573_v3 = vadd.f32 %v4252_v2, %v3977_v62 }
 0xd01   : > { %v4254_v4 = vpop.f32.mrf.mxu0 }
 0xd02   : > { %v3614_v7 = vadd.f32 %v3613_v60, %v3573_v3  ;;  %v4255_v8 = vadd.f32 %v4254_v4, %v4253_v44 }
 0xd04   : > { %3620 = vst [vmem:[%s558_s11] sm:$0xff] %v3614_v7  ;;  %v3576_v17 = vadd.f32 %v4255_v8, %v3977_v62 }
 0xd06   : > { %v3617_v9 = vadd.f32 %v3616_v61, %v3576_v17 }
 0xd08   : > { %3621 = vst [vmem:[%s558_s11 + $0x8] sm:$0xff] %v3617_v9 }
 0xd09   : > { %4896 = shalt.err (!%p4893_p12)
}
 0xd0a   : > { %s4897_s20 = scalar_lea.hbm %s5581_s15, 256  ;;  %s4901_s22 = scalar_lea.hbm %s5637_s13, 512 }
 0xd0b   : > { %p4898_p13 = scmp.ne.s32.totalorder %s5581_s15, %s4897_s20  ;;  %p4902_p2 = scmp.lt.s32.totalorder %s5581_s15, %s5637_s13 }
 0xd0c   : > { %p4903_p5 = scmp.lt.s32.totalorder %s4901_s22, %s4897_s20 }
 0xd0d   : > { %p4899_p4 = pnand %p4898_p13, %p5682_p11 }
 0xd0e   : > { %p4904_p8 = por %p4903_p5, %p4902_p2 }
 0xd0f   : > { %p4900_p0 = pneg %p4899_p4 }
 0xd11   : > { %p4905_p10 = pnand %p4904_p8, %p4900_p0 }
 0xd13   : > { %4908 = shalt.err (!%p4905_p10)
}
 0xd14   : > { %s4980_s3 = smov 128   ;;  %s4981_s5 = smov 8  }
 0xd15   : > { %4375 = dma.vmem_to_hbm [thread:$0]  (%p5682_p11), %s5576_s2, 256, %s5581_s15, %s3623_s23, %s4980_s3, %s4980_s3, %s4981_s5  }
 0xd16 PF: > { %s3651_s1 = sand.u32 1, %s4951_s25   ;;  %p5683_p1 = scmp.ne.s32.totalorder %s5664_s17, 0 }
 0xd17   : > { %p5684_p3 = scmp.ge.s32.totalorder %s4963_s28, 2  ;;  %s3652_s14 = scalar_lea.sflag [#allocation4], %s3651_s1 }
 0xd19   : > { %p4404_p7 = pnand %p5684_p3, %p5683_p1 }
 0xd1b   : > { %p4405_p9 = pneg %p4404_p7 }
 0xd1d   : > { %4946 = dma.done.wait (%p4405_p9), %s3652_s14, 256  }
 0xd1e   : > { %4948 = vsyncadd (%p4405_p9), %s3652_s14, 4294967040  ;;  %p30_p6 = scmp.ge.s32.totalorder %s5180_s21, 4   ;;  %s5685_s25 = smov %s4955_s26 }
 0xd1f   : > { %s5686_s26 = smov %s4959_s27  ;;  %s5687_s27 = smov %s5192_s16 }
 0xd20   : > { %s5688_s28 = smov %s5180_s21  ;;  %32 = sbr.rel (!%p30_p6) target bundleno = 17 (0x11), region = 145 }
 0xd25   :  { %3657 = vsyncpa [#allocation3], 1 }
 0xd26   :  { %3659 = vsyncpa [#allocation3 + $0x1], 1 }
 0xd27   :  { %3660 = vsyncpa [#allocation6], 1 }
 0xd28   :  { %3661 = vsyncpa [#allocation9], 1 }
 0xd29   :  { %3662 = vsyncpa [#allocation12], 1 }
 0xd2a   :  { %3663 = vsyncpa [#allocation15], 1 }
 0xd2b   :  { %3664 = vsyncpa [#allocation4], 1 }
 0xd2c   :  { %3666 = vsyncpa [#allocation4 + $0x1], 1 }

</bundles_post_ra>
